<compile_context>
chip_gen: v6e
topology: v6e:2x2x1
jax: 0.10.0
libtpu: 0.0.40
codegen_flags: <defaults>
</compile_context>

<pallas_src>
import math
import functools

import jax
import jax.numpy as jnp
from jax.experimental import pallas as pl
from jax.experimental.pallas import tpu as pltpu

BN_EPS = 1e-5          # torch.nn.BatchNorm2d default
HEAD_CHANNELS = 512    # hardcoded in DecoderCup


# --------------------------------------------------------------------------- #
# Pallas kernel: fused 3x3 conv (pad=1) + folded BatchNorm(+bias) + ReLU, NHWC #
# --------------------------------------------------------------------------- #
def _conv3x3_bn_relu_kernel(H, W, x_ref, w_ref, scale_ref, shift_ref, out_ref):
    """One batch element per grid step.

    x_ref:     (1, H+2, W+2, Cin)  zero-padded input tile
    w_ref:     (9, Cin, Cout)      3x3 taps in row-major (dy, dx) order
    scale_ref: (1, Cout)           folded BN scale
    shift_ref: (1, Cout)           folded BN shift (includes conv bias)
    out_ref:   (1, H, W, Cout)
    """
    cin = w_ref.shape[1]
    cout = w_ref.shape[2]
    acc = jnp.zeros((H * W, cout), jnp.float32)
    for t in range(9):                       # static 3x3 tap loop -> 9 MXU matmuls
        dy, dx = divmod(t, 3)
        slab = x_ref[0, dy:dy + H, dx:dx + W, :]          # (H, W, Cin) strided load
        slab = slab.reshape(H * W, cin)                   # layout-trivial (W % 8 == 0)
        acc = acc + jnp.dot(slab, w_ref[t], preferred_element_type=jnp.float32)
    y = acc * scale_ref[...] + shift_ref[...]             # folded BatchNorm (+bias)
    y = jnp.maximum(y, 0.0)                               # ReLU
    out_ref[0] = y.reshape(H, W, cout).astype(out_ref.dtype)


def conv3x3_bn_relu(x_nhwc, w9, scale, shift):
    """x_nhwc: (B, H, W, Cin) f32.  w9: (9, Cin, Cout).  scale/shift: (1, Cout)."""
    B, H, W, cin = x_nhwc.shape
    cout = w9.shape[-1]
    x_pad = jnp.pad(x_nhwc, ((0, 0), (1, 1), (1, 1), (0, 0)))
    kernel = functools.partial(_conv3x3_bn_relu_kernel, H, W)
    return pl.pallas_call(
        kernel,
        out_shape=jax.ShapeDtypeStruct((B, H, W, cout), x_nhwc.dtype),
        grid_spec=pltpu.PrefetchScalarGridSpec(
            num_scalar_prefetch=0,
            grid=(B,),
            in_specs=[
                pl.BlockSpec((1, H + 2, W + 2, cin), lambda b: (b, 0, 0, 0)),
                pl.BlockSpec((9, cin, cout), lambda b: (0, 0, 0)),
                pl.BlockSpec((1, cout), lambda b: (0, 0)),
                pl.BlockSpec((1, cout), lambda b: (0, 0)),
            ],
            out_specs=pl.BlockSpec((1, H, W, cout), lambda b: (b, 0, 0, 0)),
        ),
        compiler_params=pltpu.CompilerParams(
            dimension_semantics=("parallel",)),
    )(x_pad, w9, scale, shift)


# --------------------------------------------------------------------------- #
# Bilinear 2x upsample, align_corners=True (torch.nn.UpsamplingBilinear2d)     #
# --------------------------------------------------------------------------- #
def _interp_matrix(n_in, n_out):
    rows = jnp.arange(n_out)
    src = rows.astype(jnp.float32) * (n_in - 1) / (n_out - 1)
    i0 = jnp.floor(src).astype(jnp.int32)
    i1 = jnp.minimum(i0 + 1, n_in - 1)
    f = src - i0.astype(jnp.float32)
    m = jnp.zeros((n_out, n_in), jnp.float32)
    m = m.at[rows, i0].add(1.0 - f)
    m = m.at[rows, i1].add(f)
    return m


def upsample2x_nhwc(x):
    # TODO(synk): fuse this bilinear upsample into the Pallas conv kernel.
    B, H, W, C = x.shape
    mh = _interp_matrix(H, 2 * H)
    mw = _interp_matrix(W, 2 * W)
    hi = jax.lax.Precision.HIGHEST
    x = jnp.einsum("oh,bhwc->bowc", mh, x, precision=hi)
    x = jnp.einsum("pw,bhwc->bhpc", mw, x, precision=hi)
    return x


# --------------------------------------------------------------------------- #
# DecoderCup forward (Pallas convs)                                            #
# --------------------------------------------------------------------------- #
def _fold_conv_bn(p):
    """Fold eval-mode BatchNorm (+ conv bias) into (w9, scale, shift)."""
    cin, cout = p["w"].shape[2], p["w"].shape[3]
    scale = p["gamma"] / jnp.sqrt(p["var"] + BN_EPS)
    shift = p["beta"] + (p["b"] - p["mean"]) * scale
    return (p["w"].reshape(9, cin, cout),
            scale.reshape(1, cout).astype(jnp.float32),
            shift.reshape(1, cout).astype(jnp.float32))


def decoder_cup_forward(hidden_states, params):
    """hidden_states: (B, n_patch, hidden).  Returns NCHW (B, C, H, W) like PyTorch."""
    # TODO(synk): DecoderBlock skip-feature concat path (features is not None) is not
    # implemented; this forward corresponds to features=None (skip=None for every block).
    B, n_patch, hidden = hidden_states.shape
    h = w = int(math.isqrt(n_patch))
    # permute(0,2,1).view(B, hidden, h, w) in NCHW  ==  reshape(B, h, w, hidden) in NHWC
    x = hidden_states.reshape(B, h, w, hidden)
    x = conv3x3_bn_relu(x, *_fold_conv_bn(params["conv_more"]))
    for blk in params["blocks"]:
        x = upsample2x_nhwc(x)
        x = conv3x3_bn_relu(x, *_fold_conv_bn(blk["conv1"]))
        x = conv3x3_bn_relu(x, *_fold_conv_bn(blk["conv2"]))
    return x.transpose(0, 3, 1, 2)


# --------------------------------------------------------------------------- #
# Pure-JAX reference (independent code path)                                   #
# --------------------------------------------------------------------------- #
def _conv_bn_relu_ref(x_nhwc, p):
    y = jax.lax.conv_general_dilated(
        x_nhwc, p["w"], window_strides=(1, 1), padding=((1, 1), (1, 1)),
        dimension_numbers=("NHWC", "HWIO", "NHWC"),
        precision=jax.lax.Precision.HIGHEST)
    y = y + p["b"]
    y = (y - p["mean"]) / jnp.sqrt(p["var"] + BN_EPS) * p["gamma"] + p["beta"]
    return jnp.maximum(y, 0.0)


def _upsample2x_ref(x):
    B, H, W, C = x.shape

    def coords(n_in, n_out):
        src = jnp.arange(n_out, dtype=jnp.float32) * (n_in - 1) / (n_out - 1)
        i0 = jnp.floor(src).astype(jnp.int32)
        i1 = jnp.minimum(i0 + 1, n_in - 1)
        f = src - i0.astype(jnp.float32)
        return i0, i1, f

    i0, i1, fh = coords(H, 2 * H)
    x = (x[:, i0, :, :] * (1.0 - fh)[None, :, None, None]
         + x[:, i1, :, :] * fh[None, :, None, None])
    j0, j1, fw = coords(W, 2 * W)
    x = (x[:, :, j0, :] * (1.0 - fw)[None, None, :, None]
         + x[:, :, j1, :] * fw[None, None, :, None])
    return x


def decoder_cup_reference(hidden_states, params):
    B, n_patch, hidden = hidden_states.shape
    h = w = int(math.isqrt(n_patch))
    x = hidden_states.reshape(B, h, w, hidden)
    x = _conv_bn_relu_ref(x, params["conv_more"])
    for blk in params["blocks"]:
        x = _upsample2x_ref(x)
        x = _conv_bn_relu_ref(x, blk["conv1"])
        x = _conv_bn_relu_ref(x, blk["conv2"])
    return x.transpose(0, 3, 1, 2)


# --------------------------------------------------------------------------- #
# Parameters                                                                   #
# --------------------------------------------------------------------------- #
def init_params(key, hidden, decoder_channels):
    in_chs = [HEAD_CHANNELS] + list(decoder_channels[:-1])
    out_chs = list(decoder_channels)

    def conv_bn(k, cin, cout, use_bias):
        kw, kb, kg, kbe, km, kv = jax.random.split(k, 6)
        std = 1.0 / math.sqrt(9 * cin)
        return {
            "w": std * jax.random.normal(kw, (3, 3, cin, cout), jnp.float32),  # HWIO
            "b": (0.1 * jax.random.normal(kb, (cout,), jnp.float32)
                  if use_bias else jnp.zeros((cout,), jnp.float32)),
            "gamma": 1.0 + 0.1 * jax.random.normal(kg, (cout,), jnp.float32),
            "beta": 0.1 * jax.random.normal(kbe, (cout,), jnp.float32),
            "mean": 0.1 * jax.random.normal(km, (cout,), jnp.float32),
            "var": jax.random.uniform(kv, (cout,), jnp.float32, 0.5, 1.5),
        }

    keys = jax.random.split(key, 1 + 2 * len(out_chs))
    params = {
        # conv_more: use_batchnorm=True -> conv bias=False (kept as zeros)
        "conv_more": conv_bn(keys[0], hidden, HEAD_CHANNELS, use_bias=False),
        "blocks": [],
    }
    for i, (cin, cout) in enumerate(zip(in_chs, out_chs)):
        # n_skip == 0 -> DecoderBlock(use_batchnorm=0) -> conv bias=True, BN still applied
        params["blocks"].append({
            "conv1": conv_bn(keys[1 + 2 * i], cin, cout, use_bias=True),
            "conv2": conv_bn(keys[2 + 2 * i], cout, cout, use_bias=True),
        })
    return params


if __name__ == "__main__":
    # Small shapes consistent with DecoderCup.forward: (B, n_patch, hidden) with
    # n_patch a perfect square.  h=w=8 keeps every spatial size a multiple of 8.
    B, n_patch, hidden = 2, 64, 32
    decoder_channels = (64, 32, 16)        # 3 decoder blocks: 8->16->32->64 spatial

    key = jax.random.PRNGKey(0)
    kx, kp = jax.random.split(key)
    hidden_states = jax.random.normal(kx, (B, n_patch, hidden), jnp.float32)
    params = init_params(kp, hidden, decoder_channels)

    out = decoder_cup_forward(hidden_states, params)
    out = jax.block_until_ready(out)

    ref = decoder_cup_reference(hidden_states, params)
    ref = jax.block_until_ready(ref)

    assert out.shape == (B, decoder_channels[-1], 64, 64), out.shape
    assert out.shape == ref.shape
    max_err = float(jnp.max(jnp.abs(out - ref)))
    assert jnp.allclose(out, ref, atol=1e-3, rtol=1e-3), f"max err {max_err}"

    print("KERNEL_OK")
</pallas_src>

<mosaic_0001>
module attributes {stable_mosaic.version = 11 : i64} {
  func.func @_conv3x3_bn_relu_kernel(%arg0: i32, %arg1: memref<1x10x10x32xf32, #tpu.memory_space<vmem>>, %arg2: memref<9x32x512xf32, #tpu.memory_space<vmem>>, %arg3: memref<1x512xf32, #tpu.memory_space<vmem>>, %arg4: memref<1x512xf32, #tpu.memory_space<vmem>>, %arg5: memref<1x8x8x512xf32, #tpu.memory_space<vmem>>) attributes {dimension_semantics = [#tpu.dimension_semantics<parallel>], iteration_bounds = array<i64: 2>, scalar_prefetch = 0 : i64, scratch_operands = 0 : i64, tpu.core_type = #tpu.core_type<tc>, window_params = [{transform_indices = @transform_0, window_bounds = array<i64: 1, 10, 10, 32>}, {pipeline_mode = #tpu.pipeline_mode<synchronous>, transform_indices = @transform_1, window_bounds = array<i64: 9, 32, 512>}, {pipeline_mode = #tpu.pipeline_mode<synchronous>, transform_indices = @transform_2, window_bounds = array<i64: 1, 512>}, {pipeline_mode = #tpu.pipeline_mode<synchronous>, transform_indices = @transform_3, window_bounds = array<i64: 1, 512>}, {transform_indices = @transform_4, window_bounds = array<i64: 1, 8, 8, 512>}]} {
    %cst = arith.constant 0.000000e+00 : f32
    %0 = vector.broadcast %cst : f32 to vector<64x512xf32>
    %c0 = arith.constant 0 : index
    %c0_0 = arith.constant 0 : index
    %c0_1 = arith.constant 0 : index
    %c0_2 = arith.constant 0 : index
    %1 = vector.load %arg1[%c0, %c0_0, %c0_1, %c0_2] : memref<1x10x10x32xf32, #tpu.memory_space<vmem>>, vector<1x8x8x32xf32>
    %2 = vector.shape_cast %1 : vector<1x8x8x32xf32> to vector<8x8x32xf32>
    %3 = vector.shape_cast %2 : vector<8x8x32xf32> to vector<64x32xf32>
    %c0_3 = arith.constant 0 : index
    %c0_4 = arith.constant 0 : index
    %c0_5 = arith.constant 0 : index
    %4 = vector.load %arg2[%c0_3, %c0_4, %c0_5] : memref<9x32x512xf32, #tpu.memory_space<vmem>>, vector<1x32x512xf32>
    %5 = vector.shape_cast %4 : vector<1x32x512xf32> to vector<32x512xf32>
    %cst_6 = arith.constant dense<0.000000e+00> : vector<64x512xf32>
    %6 = tpu.matmul %3, %5, %cst_6 {dimension_numbers = #tpu.dot_dimension_numbers<[1], [0], [0], [1], [0, 0, 1, 1], [], []>} : vector<64x32xf32>, vector<32x512xf32>, vector<64x512xf32> -> vector<64x512xf32>
    %7 = arith.addf %0, %6 : vector<64x512xf32>
    %c0_7 = arith.constant 0 : index
    %c0_8 = arith.constant 0 : index
    %c1 = arith.constant 1 : index
    %c0_9 = arith.constant 0 : index
    %8 = vector.load %arg1[%c0_7, %c0_8, %c1, %c0_9] : memref<1x10x10x32xf32, #tpu.memory_space<vmem>>, vector<1x8x8x32xf32>
    %9 = vector.shape_cast %8 : vector<1x8x8x32xf32> to vector<8x8x32xf32>
    %10 = vector.shape_cast %9 : vector<8x8x32xf32> to vector<64x32xf32>
    %c1_10 = arith.constant 1 : index
    %c0_11 = arith.constant 0 : index
    %c0_12 = arith.constant 0 : index
    %11 = vector.load %arg2[%c1_10, %c0_11, %c0_12] : memref<9x32x512xf32, #tpu.memory_space<vmem>>, vector<1x32x512xf32>
    %12 = vector.shape_cast %11 : vector<1x32x512xf32> to vector<32x512xf32>
    %cst_13 = arith.constant dense<0.000000e+00> : vector<64x512xf32>
    %13 = tpu.matmul %10, %12, %cst_13 {dimension_numbers = #tpu.dot_dimension_numbers<[1], [0], [0], [1], [0, 0, 1, 1], [], []>} : vector<64x32xf32>, vector<32x512xf32>, vector<64x512xf32> -> vector<64x512xf32>
    %14 = arith.addf %7, %13 : vector<64x512xf32>
    %c0_14 = arith.constant 0 : index
    %c0_15 = arith.constant 0 : index
    %c2 = arith.constant 2 : index
    %c0_16 = arith.constant 0 : index
    %15 = vector.load %arg1[%c0_14, %c0_15, %c2, %c0_16] : memref<1x10x10x32xf32, #tpu.memory_space<vmem>>, vector<1x8x8x32xf32>
    %16 = vector.shape_cast %15 : vector<1x8x8x32xf32> to vector<8x8x32xf32>
    %17 = vector.shape_cast %16 : vector<8x8x32xf32> to vector<64x32xf32>
    %c2_17 = arith.constant 2 : index
    %c0_18 = arith.constant 0 : index
    %c0_19 = arith.constant 0 : index
    %18 = vector.load %arg2[%c2_17, %c0_18, %c0_19] : memref<9x32x512xf32, #tpu.memory_space<vmem>>, vector<1x32x512xf32>
    %19 = vector.shape_cast %18 : vector<1x32x512xf32> to vector<32x512xf32>
    %cst_20 = arith.constant dense<0.000000e+00> : vector<64x512xf32>
    %20 = tpu.matmul %17, %19, %cst_20 {dimension_numbers = #tpu.dot_dimension_numbers<[1], [0], [0], [1], [0, 0, 1, 1], [], []>} : vector<64x32xf32>, vector<32x512xf32>, vector<64x512xf32> -> vector<64x512xf32>
    %21 = arith.addf %14, %20 : vector<64x512xf32>
    %c0_21 = arith.constant 0 : index
    %c1_22 = arith.constant 1 : index
    %c0_23 = arith.constant 0 : index
    %c0_24 = arith.constant 0 : index
    %22 = vector.load %arg1[%c0_21, %c1_22, %c0_23, %c0_24] : memref<1x10x10x32xf32, #tpu.memory_space<vmem>>, vector<1x8x8x32xf32>
    %23 = vector.shape_cast %22 : vector<1x8x8x32xf32> to vector<8x8x32xf32>
    %24 = vector.shape_cast %23 : vector<8x8x32xf32> to vector<64x32xf32>
    %c3 = arith.constant 3 : index
    %c0_25 = arith.constant 0 : index
    %c0_26 = arith.constant 0 : index
    %25 = vector.load %arg2[%c3, %c0_25, %c0_26] : memref<9x32x512xf32, #tpu.memory_space<vmem>>, vector<1x32x512xf32>
    %26 = vector.shape_cast %25 : vector<1x32x512xf32> to vector<32x512xf32>
    %cst_27 = arith.constant dense<0.000000e+00> : vector<64x512xf32>
    %27 = tpu.matmul %24, %26, %cst_27 {dimension_numbers = #tpu.dot_dimension_numbers<[1], [0], [0], [1], [0, 0, 1, 1], [], []>} : vector<64x32xf32>, vector<32x512xf32>, vector<64x512xf32> -> vector<64x512xf32>
    %28 = arith.addf %21, %27 : vector<64x512xf32>
    %c0_28 = arith.constant 0 : index
    %c1_29 = arith.constant 1 : index
    %c1_30 = arith.constant 1 : index
    %c0_31 = arith.constant 0 : index
    %29 = vector.load %arg1[%c0_28, %c1_29, %c1_30, %c0_31] : memref<1x10x10x32xf32, #tpu.memory_space<vmem>>, vector<1x8x8x32xf32>
    %30 = vector.shape_cast %29 : vector<1x8x8x32xf32> to vector<8x8x32xf32>
    %31 = vector.shape_cast %30 : vector<8x8x32xf32> to vector<64x32xf32>
    %c4 = arith.constant 4 : index
    %c0_32 = arith.constant 0 : index
    %c0_33 = arith.constant 0 : index
    %32 = vector.load %arg2[%c4, %c0_32, %c0_33] : memref<9x32x512xf32, #tpu.memory_space<vmem>>, vector<1x32x512xf32>
    %33 = vector.shape_cast %32 : vector<1x32x512xf32> to vector<32x512xf32>
    %cst_34 = arith.constant dense<0.000000e+00> : vector<64x512xf32>
    %34 = tpu.matmul %31, %33, %cst_34 {dimension_numbers = #tpu.dot_dimension_numbers<[1], [0], [0], [1], [0, 0, 1, 1], [], []>} : vector<64x32xf32>, vector<32x512xf32>, vector<64x512xf32> -> vector<64x512xf32>
    %35 = arith.addf %28, %34 : vector<64x512xf32>
    %c0_35 = arith.constant 0 : index
    %c1_36 = arith.constant 1 : index
    %c2_37 = arith.constant 2 : index
    %c0_38 = arith.constant 0 : index
    %36 = vector.load %arg1[%c0_35, %c1_36, %c2_37, %c0_38] : memref<1x10x10x32xf32, #tpu.memory_space<vmem>>, vector<1x8x8x32xf32>
    %37 = vector.shape_cast %36 : vector<1x8x8x32xf32> to vector<8x8x32xf32>
    %38 = vector.shape_cast %37 : vector<8x8x32xf32> to vector<64x32xf32>
    %c5 = arith.constant 5 : index
    %c0_39 = arith.constant 0 : index
    %c0_40 = arith.constant 0 : index
    %39 = vector.load %arg2[%c5, %c0_39, %c0_40] : memref<9x32x512xf32, #tpu.memory_space<vmem>>, vector<1x32x512xf32>
    %40 = vector.shape_cast %39 : vector<1x32x512xf32> to vector<32x512xf32>
    %cst_41 = arith.constant dense<0.000000e+00> : vector<64x512xf32>
    %41 = tpu.matmul %38, %40, %cst_41 {dimension_numbers = #tpu.dot_dimension_numbers<[1], [0], [0], [1], [0, 0, 1, 1], [], []>} : vector<64x32xf32>, vector<32x512xf32>, vector<64x512xf32> -> vector<64x512xf32>
    %42 = arith.addf %35, %41 : vector<64x512xf32>
    %c0_42 = arith.constant 0 : index
    %c2_43 = arith.constant 2 : index
    %c0_44 = arith.constant 0 : index
    %c0_45 = arith.constant 0 : index
    %43 = vector.load %arg1[%c0_42, %c2_43, %c0_44, %c0_45] : memref<1x10x10x32xf32, #tpu.memory_space<vmem>>, vector<1x8x8x32xf32>
    %44 = vector.shape_cast %43 : vector<1x8x8x32xf32> to vector<8x8x32xf32>
    %45 = vector.shape_cast %44 : vector<8x8x32xf32> to vector<64x32xf32>
    %c6 = arith.constant 6 : index
    %c0_46 = arith.constant 0 : index
    %c0_47 = arith.constant 0 : index
    %46 = vector.load %arg2[%c6, %c0_46, %c0_47] : memref<9x32x512xf32, #tpu.memory_space<vmem>>, vector<1x32x512xf32>
    %47 = vector.shape_cast %46 : vector<1x32x512xf32> to vector<32x512xf32>
    %cst_48 = arith.constant dense<0.000000e+00> : vector<64x512xf32>
    %48 = tpu.matmul %45, %47, %cst_48 {dimension_numbers = #tpu.dot_dimension_numbers<[1], [0], [0], [1], [0, 0, 1, 1], [], []>} : vector<64x32xf32>, vector<32x512xf32>, vector<64x512xf32> -> vector<64x512xf32>
    %49 = arith.addf %42, %48 : vector<64x512xf32>
    %c0_49 = arith.constant 0 : index
    %c2_50 = arith.constant 2 : index
    %c1_51 = arith.constant 1 : index
    %c0_52 = arith.constant 0 : index
    %50 = vector.load %arg1[%c0_49, %c2_50, %c1_51, %c0_52] : memref<1x10x10x32xf32, #tpu.memory_space<vmem>>, vector<1x8x8x32xf32>
    %51 = vector.shape_cast %50 : vector<1x8x8x32xf32> to vector<8x8x32xf32>
    %52 = vector.shape_cast %51 : vector<8x8x32xf32> to vector<64x32xf32>
    %c7 = arith.constant 7 : index
    %c0_53 = arith.constant 0 : index
    %c0_54 = arith.constant 0 : index
    %53 = vector.load %arg2[%c7, %c0_53, %c0_54] : memref<9x32x512xf32, #tpu.memory_space<vmem>>, vector<1x32x512xf32>
    %54 = vector.shape_cast %53 : vector<1x32x512xf32> to vector<32x512xf32>
    %cst_55 = arith.constant dense<0.000000e+00> : vector<64x512xf32>
    %55 = tpu.matmul %52, %54, %cst_55 {dimension_numbers = #tpu.dot_dimension_numbers<[1], [0], [0], [1], [0, 0, 1, 1], [], []>} : vector<64x32xf32>, vector<32x512xf32>, vector<64x512xf32> -> vector<64x512xf32>
    %56 = arith.addf %49, %55 : vector<64x512xf32>
    %c0_56 = arith.constant 0 : index
    %c2_57 = arith.constant 2 : index
    %c2_58 = arith.constant 2 : index
    %c0_59 = arith.constant 0 : index
    %57 = vector.load %arg1[%c0_56, %c2_57, %c2_58, %c0_59] : memref<1x10x10x32xf32, #tpu.memory_space<vmem>>, vector<1x8x8x32xf32>
    %58 = vector.shape_cast %57 : vector<1x8x8x32xf32> to vector<8x8x32xf32>
    %59 = vector.shape_cast %58 : vector<8x8x32xf32> to vector<64x32xf32>
    %c8 = arith.constant 8 : index
    %c0_60 = arith.constant 0 : index
    %c0_61 = arith.constant 0 : index
    %60 = vector.load %arg2[%c8, %c0_60, %c0_61] : memref<9x32x512xf32, #tpu.memory_space<vmem>>, vector<1x32x512xf32>
    %61 = vector.shape_cast %60 : vector<1x32x512xf32> to vector<32x512xf32>
    %cst_62 = arith.constant dense<0.000000e+00> : vector<64x512xf32>
    %62 = tpu.matmul %59, %61, %cst_62 {dimension_numbers = #tpu.dot_dimension_numbers<[1], [0], [0], [1], [0, 0, 1, 1], [], []>} : vector<64x32xf32>, vector<32x512xf32>, vector<64x512xf32> -> vector<64x512xf32>
    %63 = arith.addf %56, %62 : vector<64x512xf32>
    %c0_63 = arith.constant 0 : index
    %c0_64 = arith.constant 0 : index
    %64 = vector.load %arg3[%c0_63, %c0_64] : memref<1x512xf32, #tpu.memory_space<vmem>>, vector<1x512xf32>
    %65 = vector.broadcast %64 : vector<1x512xf32> to vector<64x512xf32>
    %66 = arith.mulf %63, %65 : vector<64x512xf32>
    %c0_65 = arith.constant 0 : index
    %c0_66 = arith.constant 0 : index
    %67 = vector.load %arg4[%c0_65, %c0_66] : memref<1x512xf32, #tpu.memory_space<vmem>>, vector<1x512xf32>
    %68 = vector.broadcast %67 : vector<1x512xf32> to vector<64x512xf32>
    %69 = arith.addf %66, %68 : vector<64x512xf32>
    %cst_67 = arith.constant 0.000000e+00 : f32
    %70 = vector.broadcast %cst_67 : f32 to vector<64x512xf32>
    %71 = arith.maximumf %69, %70 : vector<64x512xf32>
    %72 = vector.shape_cast %71 : vector<64x512xf32> to vector<8x8x512xf32>
    %c0_68 = arith.constant 0 : index
    %c0_69 = arith.constant 0 : index
    %c0_70 = arith.constant 0 : index
    %c0_71 = arith.constant 0 : index
    %73 = vector.load %arg5[%c0_68, %c0_69, %c0_70, %c0_71] : memref<1x8x8x512xf32, #tpu.memory_space<vmem>>, vector<1x8x8x512xf32>
    %74 = vector.shape_cast %73 : vector<1x8x8x512xf32> to vector<8x8x512xf32>
    %75 = vector.shape_cast %72 : vector<8x8x512xf32> to vector<1x8x8x512xf32>
    tpu.vector_store %arg5[%c0_68, %c0_69, %c0_70, %c0_71], %75 {strides = array<i32>} : memref<1x8x8x512xf32, #tpu.memory_space<vmem>>, vector<1x8x8x512xf32>,
    return
  }
  func.func @transform_0(%arg0: i32) -> (i32, i32, i32, i32) {
    %c0_i32 = arith.constant 0 : i32
    %c0_i32_0 = arith.constant 0 : i32
    %c0_i32_1 = arith.constant 0 : i32
    %c0_i32_2 = arith.constant 0 : i32
    return %arg0, %c0_i32, %c0_i32_0, %c0_i32_1 : i32, i32, i32, i32
  }
  func.func @transform_1(%arg0: i32) -> (i32, i32, i32) {
    %c0_i32 = arith.constant 0 : i32
    %c0_i32_0 = arith.constant 0 : i32
    %c0_i32_1 = arith.constant 0 : i32
    %c0_i32_2 = arith.constant 0 : i32
    return %c0_i32, %c0_i32_0, %c0_i32_1 : i32, i32, i32
  }
  func.func @transform_2(%arg0: i32) -> (i32, i32) {
    %c0_i32 = arith.constant 0 : i32
    %c0_i32_0 = arith.constant 0 : i32
    %c0_i32_1 = arith.constant 0 : i32
    return %c0_i32, %c0_i32_0 : i32, i32
  }
  func.func @transform_3(%arg0: i32) -> (i32, i32) {
    %c0_i32 = arith.constant 0 : i32
    %c0_i32_0 = arith.constant 0 : i32
    %c0_i32_1 = arith.constant 0 : i32
    return %c0_i32, %c0_i32_0 : i32, i32
  }
  func.func @transform_4(%arg0: i32) -> (i32, i32, i32, i32) {
    %c0_i32 = arith.constant 0 : i32
    %c0_i32_0 = arith.constant 0 : i32
    %c0_i32_1 = arith.constant 0 : i32
    %c0_i32_2 = arith.constant 0 : i32
    return %arg0, %c0_i32, %c0_i32_0, %c0_i32_1 : i32, i32, i32, i32
  }
}

</mosaic_0001>

<bundles_post_ra>
// kernel: tpu_custom_call.1
= control target key start
LH: loop header
LB: loop body
LE: loop exit
PB: predicated region body
PF: predicated region fallthrough
CT: control target
= control target key end

     0   :  { %9 = vsyncpa [#allocation3], 0  ;;  %s5104_s0 = inlined_call_operand.vmem [shape: f32[2,10,10,32], index: 0, kind: input, shape index: {}]   ;;  %s5105_s1 = inlined_call_operand.hbm [shape: f32[9,32,512], index: 1, kind: input, shape index: {}]   ;;  %s5106_s2 = inlined_call_operand.vmem [shape: f32[1,512], index: 2, kind: input, shape index: {}]   ;;  %s5107_s3 = inlined_call_operand.vmem [shape: f32[1,512], index: 3, kind: input, shape index: {}]   ;;  %s5108_s4 = inlined_call_operand.hbm [shape: f32[2,8,8,512], index: 4, kind: output, shape index: {}]  }
   0x1   :  { %10 = vsyncpa [#allocation4], 0 }
   0x2   :  { %12 = vsyncpa [#allocation4 + $0x1], 0  ;;  %s3558_s15 = smov 0   ;;  %s3560_s16 = smov 0  }
   0x3   :  { %s3562_s17 = smov 0   ;;  %s3564_s18 = smov 0  }
   0x4 LB: > { %s3579_s19 = sadd.s32 4294967295, %s3524_s18   ;;  %s3172_s20 = sadd.s32 4294967294, %s3524_s18   ;;  %s3524_s18 = sphi %s3564_s18, %s5204_s18   ;;  %s3520_s17 = sphi %s3562_s17, %s5203_s17   ;;  %s3516_s16 = sphi %s3560_s16, %s5202_s16   ;;  %s3512_s15 = sphi %s3558_s15, %s5201_s15  }
   0x5   : > { %s3583_s21 = sadd.s32 1, %s3524_s18   ;;  %s114_s22 = sadd.s32 1, %s3520_s17 }
   0x6   : > { %s111_s23 = ssub.s32 %s3524_s18, %s3583_s21  ;;  %p124_p0 = scmp.ne.s32.totalorder %s3520_s17, %s3516_s16 }
   0x7   : > { %p112_p1 = scmp.eq.s32.totalorder %s111_s23, 0  ;;  %p125_p2 = scmp.eq.s32.totalorder %s3579_s19, 1 }
   0x8   : > { %p130_p3 = scmp.ne.s32.totalorder %s3516_s16, %s3512_s15  ;;  %p131_p4 = scmp.eq.s32.totalorder %s3172_s20, 1 }
   0x9   : > { %s3594_s24 = scalar_select %p112_p1, %s3520_s17, %s114_s22  }
   0xa   : > { %p3596_p5 = por %p125_p2, %p124_p0  ;;  %p3600_p6 = por %p131_p4, %p130_p3 }
   0xb   : > { %p3173_p7 = scmp.ge.s32.totalorder %s3524_s18, 1  ;;  %p138_p8 = scmp.lt.s32.totalorder %s3524_s18, 3 }
   0xc   : > { %s5116_s26 = scalar_select %p3600_p6, 1, 0 }
   0xd   : > { %p3393_p9 = scmp.eq.s32.totalorder %s3579_s19, 0  ;;  %p3607_p10 = pnand %p3173_p7, %p138_p8 }
   0xe   : > { %s3526_s28 = smov [#allocation2]  }
   0xf   : > { %s150_s29 = sshll.u32 %s3526_s28, 4  ;;  %p3385_p11 = pneg %p3607_p10  ;;  %s151_s29 = int_to_ptr.vmem [resolvable:$true] %s150_s29 }
  0x10   : > { %s3445_s30 = scalar_lea.vmem %s151_s29, 18432  ;;  %p3453_p3 = scmp.lt.s32.totalorder %s151_s29, %s151_s29 }
  0x11   : > { %p3386_p12 = pnand %p3393_p9, %p3385_p11  ;;  %p3446_p0 = scmp.ne.s32.totalorder %s151_s29, %s3445_s30 }
  0x12   : > { %p3454_p4 = scmp.lt.s32.totalorder %s3445_s30, %s3445_s30 }
  0x13   : > { %p3436_p13 = pneg %p3386_p12 }
  0x14   : > { %p3455_p6 = por %p3454_p4, %p3453_p3 }
  0x15   : > { %p3448_p1 = pnand %p3446_p0, %p3436_p13 }
  0x17   : > { %p3449_p2 = pneg %p3448_p1 }
  0x19   : > { %p3456_p7 = pnand %p3455_p6, %p3449_p2 }
  0x1b   : > { %3459 = shalt.err (!%p3456_p7)
}
  0x1c   : > { %s3527_s5 = smov 512   ;;  %s3528_s6 = smov 32  }
  0x1d   : > { %3388 = dma.hbm_to_vmem [thread:$0]  (!%p3386_p12), %s5105_s1, 18432, %s151_s29, [#allocation3], %s3527_s5, %s3527_s5, %s3528_s6  }
  0x1e   : > { %180 = sbr.rel (%p3607_p10) target bundleno = 549 (0x225), region = 36 }
  0x23   : > { %3503 = dma.done.wait (%p3393_p9), [#allocation3], 18432  }
  0x24   : > { %3505 = vsyncadd (%p3393_p9), [#allocation3], 4294948864  ;;  %p206_p8 = scmp.lt.s32.totalorder %s3579_s19, 1  ;;  %v3529_v0 = vmov 0.0   ;;  %v257_v1 = vld [vmem:[#allocation2 + $0xe8] sm:$0xff]  ;;  %v259_v2 = vld [vmem:[#allocation2 + $0xf8] sm:$0xff] }
  0x25   : > { %349 = vmatprep.mubr.f32.mxu0 %v3529_v0  ;;  %462 = vmatprep.mubr.f32.mxu1 %v3529_v0  ;;  %v256_v3 = vld [vmem:[#allocation2 + $0xe0] sm:$0xff]  ;;  %v258_v4 = vld [vmem:[#allocation2 + $0xf0] sm:$0xff]  ;;  %v253_v5 = vld [vmem:[#allocation2 + $0xc8] sm:$0xff]  ;;  %vm260_vm0 = vcmask 261120   ;;  %s203_s27 = sand.u32 1, %s3516_s16   ;;  %s3377_s30 = sshll.u32 %s3579_s19, 12 }
  0x26   : > { %s207_s9 = scalar_select %p206_p8, %s3579_s19, 1  ;;  %309 = vmatprep.subr.mxu0 %v257_v1  ;;  %422 = vmatprep.subr.mxu1 %v259_v2  ;;  %v255_v6 = vld [vmem:[#allocation2 + $0xd8] sm:$0xff]  ;;  %v252_v7 = vld [vmem:[#allocation2 + $0xc0] sm:$0xff]  ;;  %v254_v8 = vld [vmem:[#allocation2 + $0xd0] sm:$0xff] }
  0x27   : > { %310 = vmatpush1.msra.mxu0 %v256_v3  ;;  %423 = vmatpush1.msra.mxu1 %v258_v4  ;;  %v249_v9 = vld [vmem:[#allocation2 + $0xa8] sm:$0xff]  ;;  %v251_v10 = vld [vmem:[#allocation2 + $0xb8] sm:$0xff]  ;;  %v248_v11 = vld [vmem:[#allocation2 + $0xa0] sm:$0xff]  ;;  %s4916_s28 = sshll.u32 %s203_s27, 8  ;;  %s5054_s8 = scalar_lea.hbm %s5108_s4, %s3377_s30 }
  0x28   : > { %s3378_s10 = smul.u32 160, %s207_s9  ;;  %311 = vmatprep.subr.mxu0 %v253_v5  ;;  %424 = vmatprep.subr.mxu1 %v255_v6  ;;  %v250_v12 = vld [vmem:[#allocation2 + $0xb0] sm:$0xff]  ;;  %v245_v13 = vld [vmem:[#allocation2 + $0x88] sm:$0xff]  ;;  %v247_v14 = vld [vmem:[#allocation2 + $0x98] sm:$0xff]  ;;  %s4941_s29 = scalar_lea.vmem [#allocation5], %s4916_s28 }
  0x29   : > { %312 = vmatpush1.msra.mxu0 %v252_v7  ;;  %425 = vmatpush1.msra.mxu1 %v254_v8  ;;  %v244_v15 = vld [vmem:[#allocation2 + $0x80] sm:$0xff]  ;;  %v246_v16 = vld [vmem:[#allocation2 + $0x90] sm:$0xff]  ;;  %v232_v18 = vld [vmem:[#allocation2 + $0x68] sm:$0xff]  ;;  %s3098_s5 = sshll.u32 %s4941_s29, 4  ;;  %s5064_s19 = scalar_lea.sflag [#allocation4], %s203_s27  ;;  %s5056_s5 = int_to_ptr.vmem [resolvable:$true] %s3098_s5 }
  0x2a   : > { %s3631_s13 = scalar_lea.vmem %s5104_s0, %s3378_s10  ;;  %313 = vmatprep.subr.mxu0 %v249_v9  ;;  %426 = vmatprep.subr.mxu1 %v251_v10  ;;  %v234_v19 = vld [vmem:[#allocation2 + $0x78] sm:$0xff]  ;;  %v231_v20 = vld [vmem:[#allocation2 + $0x60] sm:$0xff]  ;;  %v233_v21 = vld [vmem:[#allocation2 + $0x70] sm:$0xff]  ;;  %s3460_s9 = scalar_lea.vmem %s5056_s5, 4096 }
  0x2b   : > { %314 = vmatpush1.msra.mxu0 %v248_v11  ;;  %427 = vmatpush1.msra.mxu1 %v250_v12  ;;  %v235_v17 = vld [vmem:[%s3631_s13 + $0x1] sm:$0xff]  ;;  %v3637_v22 = vld [vmem:[%s3631_s13 + $0x11] sm:$0xff]  ;;  %p3461_p6 = scmp.ne.s32.totalorder %s5056_s5, %s3460_s9  ;;  %s3530_s10 = smov [#allocation5]  }
  0x2c   : > { %315 = vmatprep.subr.mxu0 %v245_v13  ;;  %428 = vmatprep.subr.mxu1 %v247_v14  ;;  %v228_v23 = vld [vmem:[#allocation2 + $0x48] sm:$0xff]  ;;  %v230_v24 = vld [vmem:[#allocation2 + $0x58] sm:$0xff]  ;;  %v227_v25 = vld [vmem:[#allocation2 + $0x40] sm:$0xff]  ;;  %s3464_s11 = sshll.u32 %s3530_s10, 4  ;;  %s3465_s11 = int_to_ptr.vmem [resolvable:$false] %s3464_s11 }
  0x2d   : > { %316 = vmatpush1.msra.mxu0 %v244_v15  ;;  %429 = vmatpush1.msra.mxu1 %v246_v16  ;;  %v229_v26 = vld [vmem:[#allocation2 + $0x50] sm:$0xff]  ;;  %v3648_v27 = vld [vmem:[%s3631_s13 + $0x21] sm:$0xff]  ;;  %v226_v29 = vld [vmem:[#allocation2 + $0x38] sm:$0xff]  ;;  %p3462_p9 = pnand %p3461_p6, %p3596_p5  ;;  %s3466_s12 = scalar_lea.vmem %s3465_s11, 8192 }
  0x2e   : > { %3180 = vmatmul.mubr.msk.f32.vlgmr.msra.gmra.mxu0 %vm260_vm0, %v235_v17  ;;  %3188 = vmatmul.mubr.msk.f32.vlgmr.msra.gmra.mxu1 %vm260_vm0, %v235_v17  ;;  %v224_v28 = vld [vmem:[#allocation2 + $0x28] sm:$0xff]  ;;  %v223_v30 = vld [vmem:[#allocation2 + $0x20] sm:$0xff]  ;;  %v225_v31 = vld [vmem:[#allocation2 + $0x30] sm:$0xff]  ;;  %p3467_p11 = scmp.lt.s32.totalorder %s5056_s5, %s3465_s11  ;;  %p3468_p12 = scmp.lt.s32.totalorder %s3466_s12, %s3460_s9 }
  0x2f   : > { %559 = vmatprep.subr.mxu0 %v232_v18  ;;  %672 = vmatprep.subr.mxu1 %v234_v19  ;;  %v3657_v32 = vld [vmem:[%s3631_s13 + $0x31] sm:$0xff]  ;;  %v220_v33 = vld [vmem:[#allocation2 + $0x8] sm:$0xff]  ;;  %v219_v35 = vld [vmem:[#allocation2] sm:$0xff]  ;;  %p3463_p10 = pneg %p3462_p9 }
  0x30   : > { %560 = vmatpush1.msra.mxu0 %v231_v20  ;;  %673 = vmatpush1.msra.mxu1 %v233_v21  ;;  %v222_v34 = vld [vmem:[#allocation2 + $0x18] sm:$0xff]  ;;  %v221_v36 = vld [vmem:[#allocation2 + $0x10] sm:$0xff]  ;;  %v3666_v37 = vld [vmem:[%s3631_s13 + $0x41] sm:$0xff]  ;;  %p3469_p13 = por %p3468_p12, %p3467_p11 }
  0x31   : > { %355 = vmatprep.mubr.f32.mxu0 %v3529_v0  ;;  %468 = vmatprep.mubr.f32.mxu1 %v3529_v0  ;;  %v783_v38 = vld [vmem:[#allocation2 + $0x168] sm:$0xff]  ;;  %v785_v39 = vld [vmem:[#allocation2 + $0x178] sm:$0xff]  ;;  %v211_v43 = vld [vmem:[%s3631_s13] sm:$0xff] }
  0x32   : > { %3181 = vmatmul.mubr.msk.f32.gmra.mxu0 %vm260_vm0, %v3637_v22  ;;  %3189 = vmatmul.mubr.msk.f32.gmra.mxu1 %vm260_vm0, %v3637_v22  ;;  %v3675_v40 = vld [vmem:[%s3631_s13 + $0x51] sm:$0xff]  ;;  %v3684_v41 = vld [vmem:[%s3631_s13 + $0x61] sm:$0xff]  ;;  %p3470_p0 = pnand %p3469_p13, %p3463_p10 }
  0x33   : > { %361 = vmatprep.mubr.f32.mxu0 %v3529_v0  ;;  %474 = vmatprep.mubr.f32.mxu1 %v3529_v0  ;;  %v3693_v42 = vld [vmem:[%s3631_s13 + $0x71] sm:$0xff]  ;;  %v782_v44 = vld [vmem:[#allocation2 + $0x160] sm:$0xff]  ;;  %v779_v46 = vld [vmem:[#allocation2 + $0x148] sm:$0xff] }
  0x34   : > { %561 = vmatprep.subr.mxu0 %v228_v23  ;;  %674 = vmatprep.subr.mxu1 %v230_v24  ;;  %v784_v45 = vld [vmem:[#allocation2 + $0x170] sm:$0xff]  ;;  %v781_v47 = vld [vmem:[#allocation2 + $0x158] sm:$0xff]  ;;  %v778_v49 = vld [vmem:[#allocation2 + $0x140] sm:$0xff] }
  0x35   : > { %562 = vmatpush1.msra.mxu0 %v227_v25  ;;  %675 = vmatpush1.msra.mxu1 %v229_v26  ;;  %v3705_v48 = vld [vmem:[%s3631_s13 + $0x10] sm:$0xff]  ;;  %v775_v51 = vld [vmem:[#allocation2 + $0x128] sm:$0xff]  ;;  %v777_v52 = vld [vmem:[#allocation2 + $0x138] sm:$0xff] }
  0x36   : > { %3182 = vmatmul.mubr.msk.f32.gmra.mxu0 %vm260_vm0, %v3648_v27  ;;  %3190 = vmatmul.mubr.msk.f32.gmra.mxu1 %vm260_vm0, %v3648_v27  ;;  %v780_v50 = vld [vmem:[#allocation2 + $0x150] sm:$0xff]  ;;  %v3716_v53 = vld [vmem:[%s3631_s13 + $0x20] sm:$0xff]  ;;  %v771_v56 = vld [vmem:[#allocation2 + $0x108] sm:$0xff] }
  0x37   : > { %367 = vmatprep.mubr.f32.mxu0 %v3529_v0  ;;  %480 = vmatprep.mubr.f32.mxu1 %v3529_v0  ;;  %v774_v54 = vld [vmem:[#allocation2 + $0x120] sm:$0xff]  ;;  %v776_v55 = vld [vmem:[#allocation2 + $0x130] sm:$0xff]  ;;  %v773_v57 = vld [vmem:[#allocation2 + $0x118] sm:$0xff] }
  0x38   : > { %563 = vmatprep.subr.mxu0 %v224_v28  ;;  %676 = vmatprep.subr.mxu1 %v226_v29  ;;  %v3725_v58 = vld [vmem:[%s3631_s13 + $0x30] sm:$0xff]  ;;  %v770_v59 = vld [vmem:[#allocation2 + $0x100] sm:$0xff]  ;;  %v1091_v61 = vld [vmem:[#allocation2 + $0x1e8] sm:$0xff] }
  0x39   : > { %564 = vmatpush1.msra.mxu0 %v223_v30  ;;  %677 = vmatpush1.msra.mxu1 %v225_v31  ;;  %v772_v60 = vld [vmem:[#allocation2 + $0x110] sm:$0xff]  ;;  %v1093_v62 = vld [vmem:[#allocation2 + $0x1f8] sm:$0xff]  ;;  %v3734_v63 = vld [vmem:[%s3631_s13 + $0x40] sm:$0xff] }
  0x3a   : > { %3183 = vmatmul.mubr.msk.f32.gmra.mxu0 %vm260_vm0, %v3657_v32  ;;  %3191 = vmatmul.mubr.msk.f32.gmra.mxu1 %vm260_vm0, %v3657_v32  ;;  %v3743_v1 = vld [vmem:[%s3631_s13 + $0x50] sm:$0xff]  ;;  %v3752_v2 = vld [vmem:[%s3631_s13 + $0x60] sm:$0xff]  ;;  %v1087_v7 = vld [vmem:[#allocation2 + $0x1c8] sm:$0xff] }
  0x3b   : > { %373 = vmatprep.mubr.f32.mxu0 %v3529_v0  ;;  %486 = vmatprep.mubr.f32.mxu1 %v3529_v0  ;;  %v3761_v3 = vld [vmem:[%s3631_s13 + $0x70] sm:$0xff]  ;;  %v761_v4 = vld [vmem:[%s3631_s13 + $0x2] sm:$0xff]  ;;  %v1089_v8 = vld [vmem:[#allocation2 + $0x1d8] sm:$0xff] }
  0x3c   : > { %565 = vmatprep.subr.mxu0 %v220_v33  ;;  %678 = vmatprep.subr.mxu1 %v222_v34  ;;  %v1090_v5 = vld [vmem:[#allocation2 + $0x1e0] sm:$0xff]  ;;  %v1092_v6 = vld [vmem:[#allocation2 + $0x1f0] sm:$0xff]  ;;  %v1083_v12 = vld [vmem:[#allocation2 + $0x1a8] sm:$0xff] }
  0x3d   : > { %566 = vmatpush1.msra.mxu0 %v219_v35  ;;  %679 = vmatpush1.msra.mxu1 %v221_v36  ;;  %v3773_v9 = vld [vmem:[%s3631_s13 + $0x12] sm:$0xff]  ;;  %v1086_v10 = vld [vmem:[#allocation2 + $0x1c0] sm:$0xff]  ;;  %v1079_v17 = vld [vmem:[#allocation2 + $0x188] sm:$0xff] }
  0x3e   : > { %3184 = vmatmul.mubr.msk.f32.gmra.mxu0 %vm260_vm0, %v3666_v37  ;;  %3192 = vmatmul.mubr.msk.f32.gmra.mxu1 %vm260_vm0, %v3666_v37  ;;  %v1088_v11 = vld [vmem:[#allocation2 + $0x1d0] sm:$0xff]  ;;  %v1085_v13 = vld [vmem:[#allocation2 + $0x1b8] sm:$0xff]  ;;  %v3784_v14 = vld [vmem:[%s3631_s13 + $0x22] sm:$0xff] }
  0x3f   : > { %379 = vmatprep.mubr.f32.mxu0 %v3529_v0  ;;  %492 = vmatprep.mubr.f32.mxu1 %v3529_v0  ;;  %v1082_v15 = vld [vmem:[#allocation2 + $0x1a0] sm:$0xff]  ;;  %v1084_v16 = vld [vmem:[#allocation2 + $0x1b0] sm:$0xff]  ;;  %v1081_v18 = vld [vmem:[#allocation2 + $0x198] sm:$0xff] }
  0x40   : > { %834 = vmatprep.subr.mxu0 %v783_v38  ;;  %947 = vmatprep.subr.mxu1 %v785_v39  ;;  %v3793_v19 = vld [vmem:[%s3631_s13 + $0x32] sm:$0xff]  ;;  %v1078_v20 = vld [vmem:[#allocation2 + $0x180] sm:$0xff]  ;;  %v1398_v23 = vld [vmem:[#allocation2 + $0x268] sm:$0xff] }
  0x41   : > { %v1080_v21 = vld [vmem:[#allocation2 + $0x190] sm:$0xff]  ;;  %v1400_v24 = vld [vmem:[#allocation2 + $0x278] sm:$0xff]  ;;  %v3802_v25 = vld [vmem:[%s3631_s13 + $0x42] sm:$0xff] }
  0x42   : > { %3185 = vmatmul.mubr.msk.f32.gmra.mxu0 %vm260_vm0, %v3675_v40  ;;  %3193 = vmatmul.mubr.msk.f32.gmra.mxu1 %vm260_vm0, %v3675_v40  ;;  %v3811_v26 = vld [vmem:[%s3631_s13 + $0x52] sm:$0xff]  ;;  %v3820_v28 = vld [vmem:[%s3631_s13 + $0x62] sm:$0xff] }
  0x43   : > { %385 = vmatprep.mubr.f32.mxu0 %v3529_v0  ;;  %498 = vmatprep.mubr.f32.mxu1 %v3529_v0  ;;  %v3829_v29 = vld [vmem:[%s3631_s13 + $0x72] sm:$0xff]  ;;  %v1397_v30 = vld [vmem:[#allocation2 + $0x260] sm:$0xff]  ;;  %v1394_v33 = vld [vmem:[#allocation2 + $0x248] sm:$0xff] }
  0x44   : > { %v1399_v31 = vld [vmem:[#allocation2 + $0x270] sm:$0xff]  ;;  %v1396_v34 = vld [vmem:[#allocation2 + $0x258] sm:$0xff]  ;;  %v1393_v35 = vld [vmem:[#allocation2 + $0x240] sm:$0xff] }
  0x45   : > { %v1395_v36 = vld [vmem:[#allocation2 + $0x250] sm:$0xff]  ;;  %v1390_v38 = vld [vmem:[#allocation2 + $0x228] sm:$0xff]  ;;  %v1392_v39 = vld [vmem:[#allocation2 + $0x238] sm:$0xff] }
  0x46   : > { %3186 = vmatmul.mubr.msk.f32.gmra.mxu0 %vm260_vm0, %v3684_v41  ;;  %3194 = vmatmul.mubr.msk.f32.gmra.mxu1 %vm260_vm0, %v3684_v41 }
  0x47   : > { %391 = vmatprep.mubr.f32.mxu0 %v3529_v0  ;;  %504 = vmatprep.mubr.f32.mxu1 %v3529_v0 }
  0x4a   : > { %3187 = vmatmul.mubr.msk.f32.gmra.mxu0 %vm260_vm0, %v3693_v42  ;;  %3195 = vmatmul.mubr.msk.f32.gmra.mxu1 %vm260_vm0, %v3693_v42 }
  0x4b   : > { %599 = vmatprep.mubr.f32.mxu0 %v3529_v0  ;;  %712 = vmatprep.mubr.f32.mxu1 %v3529_v0 }
  0x4e   : > { %3196 = vmatmul.mubr.msk.f32.vlgmr.msra.gmra.mxu0 %vm260_vm0, %v211_v43  ;;  %3204 = vmatmul.mubr.msk.f32.vlgmr.msra.gmra.mxu1 %vm260_vm0, %v211_v43  ;;  %v1389_v43 = vld [vmem:[#allocation2 + $0x220] sm:$0xff] }
  0x4f   : > { %835 = vmatpush1.msra.mxu0 %v782_v44  ;;  %948 = vmatpush1.msra.mxu1 %v784_v45  ;;  %v1391_v44 = vld [vmem:[#allocation2 + $0x230] sm:$0xff]  ;;  %v1386_v45 = vld [vmem:[#allocation2 + $0x208] sm:$0xff] }
  0x50   : > { %605 = vmatprep.mubr.f32.mxu0 %v3529_v0  ;;  %718 = vmatprep.mubr.f32.mxu1 %v3529_v0 }
  0x51   : > { %836 = vmatprep.subr.mxu0 %v779_v46  ;;  %949 = vmatprep.subr.mxu1 %v781_v47  ;;  %v1388_v46 = vld [vmem:[#allocation2 + $0x218] sm:$0xff]  ;;  %v1385_v47 = vld [vmem:[#allocation2 + $0x200] sm:$0xff] }
  0x52   : > { %3197 = vmatmul.mubr.msk.f32.gmra.mxu0 %vm260_vm0, %v3705_v48  ;;  %3205 = vmatmul.mubr.msk.f32.gmra.mxu1 %vm260_vm0, %v3705_v48 }
  0x53   : > { %611 = vmatprep.mubr.f32.mxu0 %v3529_v0  ;;  %724 = vmatprep.mubr.f32.mxu1 %v3529_v0 }
  0x54   : > { %837 = vmatpush1.msra.mxu0 %v778_v49  ;;  %950 = vmatpush1.msra.mxu1 %v780_v50  ;;  %v1705_v49 = vld [vmem:[#allocation2 + $0x2e8] sm:$0xff]  ;;  %v1707_v50 = vld [vmem:[#allocation2 + $0x2f8] sm:$0xff] }
  0x55   : > { %838 = vmatprep.subr.mxu0 %v775_v51  ;;  %951 = vmatprep.subr.mxu1 %v777_v52  ;;  %v3880_v51 = vld [vmem:[%s3631_s13 + $0x80] sm:$0xff] }
  0x56   : > { %3198 = vmatmul.mubr.msk.f32.gmra.mxu0 %vm260_vm0, %v3716_v53  ;;  %3206 = vmatmul.mubr.msk.f32.gmra.mxu1 %vm260_vm0, %v3716_v53  ;;  %v1704_v52 = vld [vmem:[#allocation2 + $0x2e0] sm:$0xff] }
  0x57   : > { %617 = vmatprep.mubr.f32.mxu0 %v3529_v0  ;;  %730 = vmatprep.mubr.f32.mxu1 %v3529_v0 }
  0x58   : > { %839 = vmatpush1.msra.mxu0 %v774_v54  ;;  %952 = vmatpush1.msra.mxu1 %v776_v55  ;;  %v1706_v54 = vld [vmem:[#allocation2 + $0x2f0] sm:$0xff]  ;;  %v1701_v55 = vld [vmem:[#allocation2 + $0x2c8] sm:$0xff] }
  0x59   : > { %840 = vmatprep.subr.mxu0 %v771_v56  ;;  %953 = vmatprep.subr.mxu1 %v773_v57  ;;  %v1703_v56 = vld [vmem:[#allocation2 + $0x2d8] sm:$0xff]  ;;  %v1700_v57 = vld [vmem:[#allocation2 + $0x2c0] sm:$0xff] }
  0x5a   : > { %3199 = vmatmul.mubr.msk.f32.gmra.mxu0 %vm260_vm0, %v3725_v58  ;;  %3207 = vmatmul.mubr.msk.f32.gmra.mxu1 %vm260_vm0, %v3725_v58 }
  0x5b   : > { %623 = vmatprep.mubr.f32.mxu0 %v3529_v0  ;;  %736 = vmatprep.mubr.f32.mxu1 %v3529_v0 }
  0x5c   : > { %841 = vmatpush1.msra.mxu0 %v770_v59  ;;  %954 = vmatpush1.msra.mxu1 %v772_v60  ;;  %v1702_v59 = vld [vmem:[#allocation2 + $0x2d0] sm:$0xff]  ;;  %v1697_v60 = vld [vmem:[#allocation2 + $0x2a8] sm:$0xff] }
  0x5d   : > { %1142 = vmatprep.subr.mxu0 %v1091_v61  ;;  %1255 = vmatprep.subr.mxu1 %v1093_v62  ;;  %v1696_v61 = vld [vmem:[#allocation2 + $0x2a0] sm:$0xff]  ;;  %v1698_v62 = vld [vmem:[#allocation2 + $0x2b0] sm:$0xff] }
  0x5e   : > { %3200 = vmatmul.mubr.msk.f32.gmra.mxu0 %vm260_vm0, %v3734_v63  ;;  %3208 = vmatmul.mubr.msk.f32.gmra.mxu1 %vm260_vm0, %v3734_v63 }
  0x5f   : > { %629 = vmatprep.mubr.f32.mxu0 %v3529_v0  ;;  %742 = vmatprep.mubr.f32.mxu1 %v3529_v0 }
  0x62   : > { %3201 = vmatmul.mubr.msk.f32.gmra.mxu0 %vm260_vm0, %v3743_v1  ;;  %3209 = vmatmul.mubr.msk.f32.gmra.mxu1 %vm260_vm0, %v3743_v1 }
  0x63   : > { %635 = vmatprep.mubr.f32.mxu0 %v3529_v0  ;;  %748 = vmatprep.mubr.f32.mxu1 %v3529_v0 }
  0x66   : > { %3202 = vmatmul.mubr.msk.f32.gmra.mxu0 %vm260_vm0, %v3752_v2  ;;  %3210 = vmatmul.mubr.msk.f32.gmra.mxu1 %vm260_vm0, %v3752_v2 }
  0x67   : > { %641 = vmatprep.mubr.f32.mxu0 %v3529_v0  ;;  %754 = vmatprep.mubr.f32.mxu1 %v3529_v0 }
  0x6a   : > { %3203 = vmatmul.mubr.msk.f32.gmra.mxu0 %vm260_vm0, %v3761_v3  ;;  %3211 = vmatmul.mubr.msk.f32.gmra.mxu1 %vm260_vm0, %v3761_v3 }
  0x6b   : > { %874 = vmatprep.mubr.f32.mxu0 %v3529_v0  ;;  %987 = vmatprep.mubr.f32.mxu1 %v3529_v0 }
  0x6e   : > { %3212 = vmatmul.mubr.msk.f32.vlgmr.msra.gmra.mxu0 %vm260_vm0, %v761_v4  ;;  %3220 = vmatmul.mubr.msk.f32.vlgmr.msra.gmra.mxu1 %vm260_vm0, %v761_v4  ;;  %v1693_v4 = vld [vmem:[#allocation2 + $0x288] sm:$0xff] }
  0x6f   : > { %1143 = vmatpush1.msra.mxu0 %v1090_v5  ;;  %1256 = vmatpush1.msra.mxu1 %v1092_v6  ;;  %v1692_v5 = vld [vmem:[#allocation2 + $0x280] sm:$0xff]  ;;  %v1694_v6 = vld [vmem:[#allocation2 + $0x290] sm:$0xff] }
  0x70   : > { %880 = vmatprep.mubr.f32.mxu0 %v3529_v0  ;;  %993 = vmatprep.mubr.f32.mxu1 %v3529_v0 }
  0x71   : > { %1144 = vmatprep.subr.mxu0 %v1087_v7  ;;  %1257 = vmatprep.subr.mxu1 %v1089_v8  ;;  %v2013_v7 = vld [vmem:[#allocation2 + $0x368] sm:$0xff]  ;;  %v2011_v8 = vld [vmem:[#allocation2 + $0x358] sm:$0xff] }
  0x72   : > { %3213 = vmatmul.mubr.msk.f32.gmra.mxu0 %vm260_vm0, %v3773_v9  ;;  %3221 = vmatmul.mubr.msk.f32.gmra.mxu1 %vm260_vm0, %v3773_v9 }
  0x73   : > { %886 = vmatprep.mubr.f32.mxu0 %v3529_v0  ;;  %999 = vmatprep.mubr.f32.mxu1 %v3529_v0 }
  0x74   : > { %1145 = vmatpush1.msra.mxu0 %v1086_v10  ;;  %1258 = vmatpush1.msra.mxu1 %v1088_v11  ;;  %v2008_v10 = vld [vmem:[#allocation2 + $0x340] sm:$0xff]  ;;  %v2010_v11 = vld [vmem:[#allocation2 + $0x350] sm:$0xff] }
  0x75   : > { %1146 = vmatprep.subr.mxu0 %v1083_v12  ;;  %1259 = vmatprep.subr.mxu1 %v1085_v13  ;;  %v2005_v12 = vld [vmem:[#allocation2 + $0x328] sm:$0xff]  ;;  %v2004_v13 = vld [vmem:[#allocation2 + $0x320] sm:$0xff] }
  0x76   : > { %3214 = vmatmul.mubr.msk.f32.gmra.mxu0 %vm260_vm0, %v3784_v14  ;;  %3222 = vmatmul.mubr.msk.f32.gmra.mxu1 %vm260_vm0, %v3784_v14 }
  0x77   : > { %892 = vmatprep.mubr.f32.mxu0 %v3529_v0  ;;  %1005 = vmatprep.mubr.f32.mxu1 %v3529_v0 }
  0x78   : > { %1147 = vmatpush1.msra.mxu0 %v1082_v15  ;;  %1260 = vmatpush1.msra.mxu1 %v1084_v16  ;;  %v2006_v15 = vld [vmem:[#allocation2 + $0x330] sm:$0xff]  ;;  %v2001_v16 = vld [vmem:[#allocation2 + $0x308] sm:$0xff] }
  0x79   : > { %1148 = vmatprep.subr.mxu0 %v1079_v17  ;;  %1261 = vmatprep.subr.mxu1 %v1081_v18  ;;  %v2000_v17 = vld [vmem:[#allocation2 + $0x300] sm:$0xff]  ;;  %v2002_v18 = vld [vmem:[#allocation2 + $0x310] sm:$0xff] }
  0x7a   : > { %3215 = vmatmul.mubr.msk.f32.gmra.mxu0 %vm260_vm0, %v3793_v19  ;;  %3223 = vmatmul.mubr.msk.f32.gmra.mxu1 %vm260_vm0, %v3793_v19 }
  0x7b   : > { %898 = vmatprep.mubr.f32.mxu0 %v3529_v0  ;;  %1011 = vmatprep.mubr.f32.mxu1 %v3529_v0 }
  0x7c   : > { %1149 = vmatpush1.msra.mxu0 %v1078_v20  ;;  %1262 = vmatpush1.msra.mxu1 %v1080_v21  ;;  %v2320_v20 = vld [vmem:[#allocation2 + $0x3e8] sm:$0xff] }
  0x7d   : > { %1449 = vmatprep.subr.mxu0 %v1398_v23  ;;  %1562 = vmatprep.subr.mxu1 %v1400_v24  ;;  %v3982_v21 = vld [vmem:[%s3631_s13 + $0x82] sm:$0xff]  ;;  %v2321_v24 = vld [vmem:[#allocation2 + $0x3f0] sm:$0xff] }
  0x7e   : > { %3216 = vmatmul.mubr.msk.f32.gmra.mxu0 %vm260_vm0, %v3802_v25  ;;  %3224 = vmatmul.mubr.msk.f32.gmra.mxu1 %vm260_vm0, %v3802_v25  ;;  %v2319_v23 = vld [vmem:[#allocation2 + $0x3e0] sm:$0xff] }
  0x7f   : > { %904 = vmatprep.mubr.f32.mxu0 %v3529_v0  ;;  %1017 = vmatprep.mubr.f32.mxu1 %v3529_v0 }
  0x82   : > { %3217 = vmatmul.mubr.msk.f32.gmra.mxu0 %vm260_vm0, %v3811_v26  ;;  %3225 = vmatmul.mubr.msk.f32.gmra.mxu1 %vm260_vm0, %v3811_v26 }
  0x83   : > { %910 = vmatprep.mubr.f32.mxu0 %v3529_v0  ;;  %1023 = vmatprep.mubr.f32.mxu1 %v3529_v0 }
  0x86   : > { %3218 = vmatmul.mubr.msk.f32.gmra.mxu0 %vm260_vm0, %v3820_v28  ;;  %3226 = vmatmul.mubr.msk.f32.gmra.mxu1 %vm260_vm0, %v3820_v28 }
  0x87   : > { %916 = vmatprep.mubr.f32.mxu0 %v3529_v0  ;;  %1029 = vmatprep.mubr.f32.mxu1 %v3529_v0 }
  0x8a   : > { %3219 = vmatmul.mubr.msk.f32.gmra.mxu0 %vm260_vm0, %v3829_v29  ;;  %3227 = vmatmul.mubr.msk.f32.gmra.mxu1 %vm260_vm0, %v3829_v29 }
  0x8b   : > { %1182 = vmatprep.mubr.f32.mxu0 %v3529_v0  ;;  %1295 = vmatprep.mubr.f32.mxu1 %v3529_v0 }
  0x8e   : > { %3236 = vmatmul.mubr.msk.f32.vlgmr.msra.gmra.mxu0 %vm260_vm0, %v3705_v48  ;;  %3244 = vmatmul.mubr.msk.f32.vlgmr.msra.gmra.mxu1 %vm260_vm0, %v3705_v48  ;;  %v1387_v48 = vld [vmem:[#allocation2 + $0x210] sm:$0xff] }
  0x8f   : > { %1450 = vmatpush1.msra.mxu0 %v1397_v30  ;;  %1563 = vmatpush1.msra.mxu1 %v1399_v31 }
  0x90   : > { %1188 = vmatprep.mubr.f32.mxu0 %v3529_v0  ;;  %1301 = vmatprep.mubr.f32.mxu1 %v3529_v0 }
  0x91   : > { %1451 = vmatprep.subr.mxu0 %v1394_v33  ;;  %1564 = vmatprep.subr.mxu1 %v1396_v34  ;;  %v2315_v33 = vld [vmem:[#allocation2 + $0x3c0] sm:$0xff]  ;;  %v2317_v34 = vld [vmem:[#allocation2 + $0x3d0] sm:$0xff] }
  0x92   : > { %3237 = vmatmul.mubr.msk.f32.gmra.mxu0 %vm260_vm0, %v3716_v53  ;;  %3245 = vmatmul.mubr.msk.f32.gmra.mxu1 %vm260_vm0, %v3716_v53 }
  0x93   : > { %1194 = vmatprep.mubr.f32.mxu0 %v3529_v0  ;;  %1307 = vmatprep.mubr.f32.mxu1 %v3529_v0 }
  0x94   : > { %1452 = vmatpush1.msra.mxu0 %v1393_v35  ;;  %1565 = vmatpush1.msra.mxu1 %v1395_v36 }
  0x95   : > { %1453 = vmatprep.subr.mxu0 %v1390_v38  ;;  %1566 = vmatprep.subr.mxu1 %v1392_v39  ;;  %v2314_v38 = vld [vmem:[#allocation2 + $0x3b8] sm:$0xff] }
  0x96   : > { %3238 = vmatmul.mubr.msk.f32.gmra.mxu0 %vm260_vm0, %v3725_v58  ;;  %3246 = vmatmul.mubr.msk.f32.gmra.mxu1 %vm260_vm0, %v3725_v58 }
  0x97   : > { %1200 = vmatprep.mubr.f32.mxu0 %v3529_v0  ;;  %1313 = vmatprep.mubr.f32.mxu1 %v3529_v0 }
  0x98   : > { %1454 = vmatpush1.msra.mxu0 %v1389_v43  ;;  %1567 = vmatpush1.msra.mxu1 %v1391_v44  ;;  %v2311_v44 = vld [vmem:[#allocation2 + $0x3a0] sm:$0xff] }
  0x99   : > { %1455 = vmatprep.subr.mxu0 %v1386_v45  ;;  %1568 = vmatprep.subr.mxu1 %v1388_v46  ;;  %v2313_v45 = vld [vmem:[#allocation2 + $0x3b0] sm:$0xff] }
  0x9a   : > { %3239 = vmatmul.mubr.msk.f32.gmra.mxu0 %vm260_vm0, %v3734_v63  ;;  %3247 = vmatmul.mubr.msk.f32.gmra.mxu1 %vm260_vm0, %v3734_v63 }
  0x9b   : > { %1206 = vmatprep.mubr.f32.mxu0 %v3529_v0  ;;  %1319 = vmatprep.mubr.f32.mxu1 %v3529_v0 }
  0x9c   : > { %1456 = vmatpush1.msra.mxu0 %v1385_v47  ;;  %1569 = vmatpush1.msra.mxu1 %v1387_v48  ;;  %v2310_v48 = vld [vmem:[#allocation2 + $0x398] sm:$0xff] }
  0x9d   : > { %1756 = vmatprep.subr.mxu0 %v1705_v49  ;;  %1869 = vmatprep.subr.mxu1 %v1707_v50 }
  0x9e   : > { %3240 = vmatmul.mubr.msk.f32.gmra.mxu0 %vm260_vm0, %v3743_v1  ;;  %3248 = vmatmul.mubr.msk.f32.gmra.mxu1 %vm260_vm0, %v3743_v1 }
  0x9f   : > { %1212 = vmatprep.mubr.f32.mxu0 %v3529_v0  ;;  %1325 = vmatprep.mubr.f32.mxu1 %v3529_v0 }
  0xa2   : > { %3241 = vmatmul.mubr.msk.f32.gmra.mxu0 %vm260_vm0, %v3752_v2  ;;  %3249 = vmatmul.mubr.msk.f32.gmra.mxu1 %vm260_vm0, %v3752_v2 }
  0xa3   : > { %1218 = vmatprep.mubr.f32.mxu0 %v3529_v0  ;;  %1331 = vmatprep.mubr.f32.mxu1 %v3529_v0 }
  0xa6   : > { %3242 = vmatmul.mubr.msk.f32.gmra.mxu0 %vm260_vm0, %v3761_v3  ;;  %3250 = vmatmul.mubr.msk.f32.gmra.mxu1 %vm260_vm0, %v3761_v3 }
  0xa7   : > { %1224 = vmatprep.mubr.f32.mxu0 %v3529_v0  ;;  %1337 = vmatprep.mubr.f32.mxu1 %v3529_v0 }
  0xaa   : > { %3243 = vmatmul.mubr.msk.f32.gmra.mxu0 %vm260_vm0, %v3880_v51  ;;  %3251 = vmatmul.mubr.msk.f32.gmra.mxu1 %vm260_vm0, %v3880_v51 }
  0xab   : > { %1489 = vmatprep.mubr.f32.mxu0 %v3529_v0  ;;  %1602 = vmatprep.mubr.f32.mxu1 %v3529_v0 }
  0xae   : > { %3260 = vmatmul.mubr.msk.f32.vlgmr.msra.gmra.mxu0 %vm260_vm0, %v3637_v22  ;;  %3268 = vmatmul.mubr.msk.f32.vlgmr.msra.gmra.mxu1 %vm260_vm0, %v3637_v22  ;;  %v1699_v22 = vld [vmem:[#allocation2 + $0x2b8] sm:$0xff] }
  0xaf   : > { %1757 = vmatpush1.msra.mxu0 %v1704_v52  ;;  %1870 = vmatpush1.msra.mxu1 %v1706_v54  ;;  %v2307_v52 = vld [vmem:[#allocation2 + $0x380] sm:$0xff]  ;;  %v2309_v54 = vld [vmem:[#allocation2 + $0x390] sm:$0xff] }
  0xb0   : > { %1495 = vmatprep.mubr.f32.mxu0 %v3529_v0  ;;  %1608 = vmatprep.mubr.f32.mxu1 %v3529_v0 }
  0xb1   : > { %1758 = vmatprep.subr.mxu0 %v1701_v55  ;;  %1871 = vmatprep.subr.mxu1 %v1703_v56 }
  0xb2   : > { %3261 = vmatmul.mubr.msk.f32.gmra.mxu0 %vm260_vm0, %v3648_v27  ;;  %3269 = vmatmul.mubr.msk.f32.gmra.mxu1 %vm260_vm0, %v3648_v27  ;;  %v1695_v27 = vld [vmem:[#allocation2 + $0x298] sm:$0xff] }
  0xb3   : > { %1501 = vmatprep.mubr.f32.mxu0 %v3529_v0  ;;  %1614 = vmatprep.mubr.f32.mxu1 %v3529_v0 }
  0xb4   : > { %1759 = vmatpush1.msra.mxu0 %v1700_v57  ;;  %1872 = vmatpush1.msra.mxu1 %v1702_v59  ;;  %v2629_v57 = vld [vmem:[#allocation2 + $0x478] sm:$0xff] }
  0xb5   : > { %1760 = vmatprep.subr.mxu0 %v1697_v60  ;;  %1873 = vmatprep.subr.mxu1 %v1699_v22 }
  0xb6   : > { %3262 = vmatmul.mubr.msk.f32.gmra.mxu0 %vm260_vm0, %v3657_v32  ;;  %3270 = vmatmul.mubr.msk.f32.gmra.mxu1 %vm260_vm0, %v3657_v32  ;;  %v2015_v32 = vld [vmem:[#allocation2 + $0x378] sm:$0xff] }
  0xb7   : > { %1507 = vmatprep.mubr.f32.mxu0 %v3529_v0  ;;  %1620 = vmatprep.mubr.f32.mxu1 %v3529_v0 }
  0xb8   : > { %1761 = vmatpush1.msra.mxu0 %v1696_v61  ;;  %1874 = vmatpush1.msra.mxu1 %v1698_v62 }
  0xb9   : > { %1762 = vmatprep.subr.mxu0 %v1693_v4  ;;  %1875 = vmatprep.subr.mxu1 %v1695_v27 }
  0xba   : > { %3263 = vmatmul.mubr.msk.f32.gmra.mxu0 %vm260_vm0, %v3666_v37  ;;  %3271 = vmatmul.mubr.msk.f32.gmra.mxu1 %vm260_vm0, %v3666_v37  ;;  %v3931_v37 = vld [vmem:[%s3631_s13 + $0x81] sm:$0xff] }
  0xbb   : > { %1513 = vmatprep.mubr.f32.mxu0 %v3529_v0  ;;  %1626 = vmatprep.mubr.f32.mxu1 %v3529_v0 }
  0xbc   : > { %1763 = vmatpush1.msra.mxu0 %v1692_v5  ;;  %1876 = vmatpush1.msra.mxu1 %v1694_v6 }
  0xbd   : > { %2064 = vmatprep.subr.mxu0 %v2013_v7  ;;  %2177 = vmatprep.subr.mxu1 %v2015_v32 }
  0xbe   : > { %3264 = vmatmul.mubr.msk.f32.gmra.mxu0 %vm260_vm0, %v3675_v40  ;;  %3272 = vmatmul.mubr.msk.f32.gmra.mxu1 %vm260_vm0, %v3675_v40  ;;  %v2012_v40 = vld [vmem:[#allocation2 + $0x360] sm:$0xff] }
  0xbf   : > { %1519 = vmatprep.mubr.f32.mxu0 %v3529_v0  ;;  %1632 = vmatprep.mubr.f32.mxu1 %v3529_v0 }
  0xc2   : > { %3265 = vmatmul.mubr.msk.f32.gmra.mxu0 %vm260_vm0, %v3684_v41  ;;  %3273 = vmatmul.mubr.msk.f32.gmra.mxu1 %vm260_vm0, %v3684_v41  ;;  %v2014_v41 = vld [vmem:[#allocation2 + $0x370] sm:$0xff] }
  0xc3   : > { %1525 = vmatprep.mubr.f32.mxu0 %v3529_v0  ;;  %1638 = vmatprep.mubr.f32.mxu1 %v3529_v0 }
  0xc6   : > { %3266 = vmatmul.mubr.msk.f32.gmra.mxu0 %vm260_vm0, %v3693_v42  ;;  %3274 = vmatmul.mubr.msk.f32.gmra.mxu1 %vm260_vm0, %v3693_v42  ;;  %v2009_v42 = vld [vmem:[#allocation2 + $0x348] sm:$0xff] }
  0xc7   : > { %1531 = vmatprep.mubr.f32.mxu0 %v3529_v0  ;;  %1644 = vmatprep.mubr.f32.mxu1 %v3529_v0 }
  0xca   : > { %3267 = vmatmul.mubr.msk.f32.gmra.mxu0 %vm260_vm0, %v3931_v37  ;;  %3275 = vmatmul.mubr.msk.f32.gmra.mxu1 %vm260_vm0, %v3931_v37 }
  0xcb   : > { %1796 = vmatprep.mubr.f32.mxu0 %v3529_v0  ;;  %1909 = vmatprep.mubr.f32.mxu1 %v3529_v0 }
  0xce   : > { %3284 = vmatmul.mubr.msk.f32.vlgmr.msra.gmra.mxu0 %vm260_vm0, %v3773_v9  ;;  %3292 = vmatmul.mubr.msk.f32.vlgmr.msra.gmra.mxu1 %vm260_vm0, %v3773_v9  ;;  %v2007_v9 = vld [vmem:[#allocation2 + $0x338] sm:$0xff] }
  0xcf   : > { %2065 = vmatpush1.msra.mxu0 %v2012_v40  ;;  %2178 = vmatpush1.msra.mxu1 %v2014_v41 }
  0xd0   : > { %1802 = vmatprep.mubr.f32.mxu0 %v3529_v0  ;;  %1915 = vmatprep.mubr.f32.mxu1 %v3529_v0 }
  0xd1   : > { %2066 = vmatprep.subr.mxu0 %v2009_v42  ;;  %2179 = vmatprep.subr.mxu1 %v2011_v8 }
  0xd2   : > { %3285 = vmatmul.mubr.msk.f32.gmra.mxu0 %vm260_vm0, %v3784_v14  ;;  %3293 = vmatmul.mubr.msk.f32.gmra.mxu1 %vm260_vm0, %v3784_v14  ;;  %v2003_v14 = vld [vmem:[#allocation2 + $0x318] sm:$0xff] }
  0xd3   : > { %1808 = vmatprep.mubr.f32.mxu0 %v3529_v0  ;;  %1921 = vmatprep.mubr.f32.mxu1 %v3529_v0 }
  0xd4   : > { %2067 = vmatpush1.msra.mxu0 %v2008_v10  ;;  %2180 = vmatpush1.msra.mxu1 %v2010_v11  ;;  %v2626_v11 = vld [vmem:[#allocation2 + $0x460] sm:$0xff] }
  0xd5   : > { %2068 = vmatprep.subr.mxu0 %v2005_v12  ;;  %2181 = vmatprep.subr.mxu1 %v2007_v9  ;;  %v2628_v12 = vld [vmem:[#allocation2 + $0x470] sm:$0xff] }
  0xd6   : > { %3286 = vmatmul.mubr.msk.f32.gmra.mxu0 %vm260_vm0, %v3793_v19  ;;  %3294 = vmatmul.mubr.msk.f32.gmra.mxu1 %vm260_vm0, %v3793_v19  ;;  %v2322_v19 = vld [vmem:[#allocation2 + $0x3f8] sm:$0xff] }
  0xd7   : > { %1814 = vmatprep.mubr.f32.mxu0 %v3529_v0  ;;  %1927 = vmatprep.mubr.f32.mxu1 %v3529_v0 }
  0xd8   : > { %2069 = vmatpush1.msra.mxu0 %v2004_v13  ;;  %2182 = vmatpush1.msra.mxu1 %v2006_v15  ;;  %v2623_v15 = vld [vmem:[#allocation2 + $0x448] sm:$0xff] }
  0xd9   : > { %2070 = vmatprep.subr.mxu0 %v2001_v16  ;;  %2183 = vmatprep.subr.mxu1 %v2003_v14  ;;  %v2625_v16 = vld [vmem:[#allocation2 + $0x458] sm:$0xff] }
  0xda   : > { %3287 = vmatmul.mubr.msk.f32.gmra.mxu0 %vm260_vm0, %v3802_v25  ;;  %3295 = vmatmul.mubr.msk.f32.gmra.mxu1 %vm260_vm0, %v3802_v25 }
  0xdb   : > { %1820 = vmatprep.mubr.f32.mxu0 %v3529_v0  ;;  %1933 = vmatprep.mubr.f32.mxu1 %v3529_v0 }
  0xdc   : > { %2071 = vmatpush1.msra.mxu0 %v2000_v17  ;;  %2184 = vmatpush1.msra.mxu1 %v2002_v18  ;;  %v3325_v18 = vld [vmem:[%s3631_s13 + $0x31] sm:$0xff] }
  0xdd   : > { %2371 = vmatprep.subr.mxu0 %v2320_v20  ;;  %2484 = vmatprep.subr.mxu1 %v2322_v19 }
  0xde   : > { %3288 = vmatmul.mubr.msk.f32.gmra.mxu0 %vm260_vm0, %v3811_v26  ;;  %3296 = vmatmul.mubr.msk.f32.gmra.mxu1 %vm260_vm0, %v3811_v26 }
  0xdf   : > { %1826 = vmatprep.mubr.f32.mxu0 %v3529_v0  ;;  %1939 = vmatprep.mubr.f32.mxu1 %v3529_v0 }
  0xe2   : > { %3289 = vmatmul.mubr.msk.f32.gmra.mxu0 %vm260_vm0, %v3820_v28  ;;  %3297 = vmatmul.mubr.msk.f32.gmra.mxu1 %vm260_vm0, %v3820_v28  ;;  %v2316_v28 = vld [vmem:[#allocation2 + $0x3c8] sm:$0xff] }
  0xe3   : > { %1832 = vmatprep.mubr.f32.mxu0 %v3529_v0  ;;  %1945 = vmatprep.mubr.f32.mxu1 %v3529_v0 }
  0xe6   : > { %3290 = vmatmul.mubr.msk.f32.gmra.mxu0 %vm260_vm0, %v3829_v29  ;;  %3298 = vmatmul.mubr.msk.f32.gmra.mxu1 %vm260_vm0, %v3829_v29  ;;  %v2318_v29 = vld [vmem:[#allocation2 + $0x3d8] sm:$0xff] }
  0xe7   : > { %1838 = vmatprep.mubr.f32.mxu0 %v3529_v0  ;;  %1951 = vmatprep.mubr.f32.mxu1 %v3529_v0 }
  0xea   : > { %3291 = vmatmul.mubr.msk.f32.gmra.mxu0 %vm260_vm0, %v3982_v21  ;;  %3299 = vmatmul.mubr.msk.f32.gmra.mxu1 %vm260_vm0, %v3982_v21 }
  0xeb   : > { %2104 = vmatprep.mubr.f32.mxu0 %v3529_v0  ;;  %2217 = vmatprep.mubr.f32.mxu1 %v3529_v0 }
  0xee   : > { %v3990_v25 = vpop.f32.mrf.mxu0  ;;  %v3992_v26 = vpop.f32.mrf.mxu1  ;;  %3308 = vmatmul.mubr.msk.f32.vlgmr.msra.gmra.mxu0 %vm260_vm0, %v3716_v53  ;;  %3316 = vmatmul.mubr.msk.f32.vlgmr.msra.gmra.mxu1 %vm260_vm0, %v3716_v53  ;;  %v2312_v53 = vld [vmem:[#allocation2 + $0x3a8] sm:$0xff] }
  0xef   : > { %2372 = vmatpush1.msra.mxu0 %v2319_v23  ;;  %2485 = vmatpush1.msra.mxu1 %v2321_v24 }
  0xf0   : > { %v3998_v30 = vpop.f32.mrf.mxu0  ;;  %v4000_v31 = vpop.f32.mrf.mxu1  ;;  %2110 = vmatprep.mubr.f32.mxu0 %v3529_v0  ;;  %2223 = vmatprep.mubr.f32.mxu1 %v3529_v0 }
  0xf1   : > { %2373 = vmatprep.subr.mxu0 %v2316_v28  ;;  %2486 = vmatprep.subr.mxu1 %v2318_v29 }
  0xf2   : > { %v4004_v35 = vpop.f32.mrf.mxu0  ;;  %v4006_v36 = vpop.f32.mrf.mxu1  ;;  %3309 = vmatmul.mubr.msk.f32.gmra.mxu0 %vm260_vm0, %v3725_v58  ;;  %3317 = vmatmul.mubr.msk.f32.gmra.mxu1 %vm260_vm0, %v3725_v58  ;;  %v2308_v58 = vld [vmem:[#allocation2 + $0x388] sm:$0xff] }
  0xf3   : > { %2116 = vmatprep.mubr.f32.mxu0 %v3529_v0  ;;  %2229 = vmatprep.mubr.f32.mxu1 %v3529_v0 }
  0xf4   : > { %v4014_v39 = vpop.f32.mrf.mxu0  ;;  %v4016_v43 = vpop.f32.mrf.mxu1  ;;  %2374 = vmatpush1.msra.mxu0 %v2315_v33  ;;  %2487 = vmatpush1.msra.mxu1 %v2317_v34  ;;  %v2619_v33 = vld [vmem:[#allocation2 + $0x428] sm:$0xff]  ;;  %v2621_v34 = vld [vmem:[#allocation2 + $0x438] sm:$0xff] }
  0xf5   : > { %2375 = vmatprep.subr.mxu0 %v2312_v53  ;;  %2488 = vmatprep.subr.mxu1 %v2314_v38 }
  0xf6   : > { %v4018_v46 = vpop.f32.mrf.mxu0  ;;  %v4020_v47 = vpop.f32.mrf.mxu1  ;;  %3310 = vmatmul.mubr.msk.f32.gmra.mxu0 %vm260_vm0, %v3734_v63  ;;  %3318 = vmatmul.mubr.msk.f32.gmra.mxu1 %vm260_vm0, %v3734_v63  ;;  %v2627_v63 = vld [vmem:[#allocation2 + $0x468] sm:$0xff] }
  0xf7   : > { %2122 = vmatprep.mubr.f32.mxu0 %v3529_v0  ;;  %2235 = vmatprep.mubr.f32.mxu1 %v3529_v0 }
  0xf8   : > { %v4028_v49 = vpop.f32.mrf.mxu0  ;;  %v4030_v50 = vpop.f32.mrf.mxu1  ;;  %2376 = vmatpush1.msra.mxu0 %v2311_v44  ;;  %2489 = vmatpush1.msra.mxu1 %v2313_v45 }
  0xf9   : > { %2377 = vmatprep.subr.mxu0 %v2308_v58  ;;  %2490 = vmatprep.subr.mxu1 %v2310_v48 }
  0xfa   : > { %v4032_v55 = vpop.f32.mrf.mxu0  ;;  %v4034_v56 = vpop.f32.mrf.mxu1  ;;  %3311 = vmatmul.mubr.msk.f32.gmra.mxu0 %vm260_vm0, %v3743_v1  ;;  %3319 = vmatmul.mubr.msk.f32.gmra.mxu1 %vm260_vm0, %v3743_v1 }
  0xfb   : > { %2128 = vmatprep.mubr.f32.mxu0 %v3529_v0  ;;  %2241 = vmatprep.mubr.f32.mxu1 %v3529_v0 }
  0xfc   : > { %v4042_v59 = vpop.f32.mrf.mxu0  ;;  %v4044_v60 = vpop.f32.mrf.mxu1  ;;  %2378 = vmatpush1.msra.mxu0 %v2307_v52  ;;  %2491 = vmatpush1.msra.mxu1 %v2309_v54  ;;  %v2615_v54 = vld [vmem:[#allocation2 + $0x408] sm:$0xff] }
  0xfd   : > { %2678 = vmatprep.subr.mxu0 %v2627_v63  ;;  %2791 = vmatprep.subr.mxu1 %v2629_v57  ;;  %v2617_v63 = vld [vmem:[#allocation2 + $0x418] sm:$0xff] }
  0xfe   : > { %v4046_v22 = vpop.f32.mrf.mxu0  ;;  %v4048_v61 = vpop.f32.mrf.mxu1  ;;  %3312 = vmatmul.mubr.msk.f32.gmra.mxu0 %vm260_vm0, %v3752_v2  ;;  %3320 = vmatmul.mubr.msk.f32.gmra.mxu1 %vm260_vm0, %v3752_v2 }
  0xff   : > { %2134 = vmatprep.mubr.f32.mxu0 %v3529_v0  ;;  %2247 = vmatprep.mubr.f32.mxu1 %v3529_v0 }
 0x100   : > { %v4056_v1 = vpop.f32.mrf.mxu0  ;;  %v4058_v62 = vpop.f32.mrf.mxu1 }
 0x102   : > { %v4060_v4 = vpop.f32.mrf.mxu0  ;;  %v4062_v27 = vpop.f32.mrf.mxu1  ;;  %3313 = vmatmul.mubr.msk.f32.gmra.mxu0 %vm260_vm0, %v3761_v3  ;;  %3321 = vmatmul.mubr.msk.f32.gmra.mxu1 %vm260_vm0, %v3761_v3  ;;  %v3307_v3 = vld [vmem:[%s3631_s13 + $0x90] sm:$0xff] }
 0x103   : > { %2140 = vmatprep.mubr.f32.mxu0 %v3529_v0  ;;  %2253 = vmatprep.mubr.f32.mxu1 %v3529_v0 }
 0x104   : > { %v4070_v2 = vpop.f32.mrf.mxu0  ;;  %v4072_v5 = vpop.f32.mrf.mxu1 }
 0x106   : > { %v4074_v6 = vpop.f32.mrf.mxu0  ;;  %v4076_v7 = vpop.f32.mrf.mxu1  ;;  %3314 = vmatmul.mubr.msk.f32.gmra.mxu0 %vm260_vm0, %v3880_v51  ;;  %3322 = vmatmul.mubr.msk.f32.gmra.mxu1 %vm260_vm0, %v3880_v51  ;;  %v3324_v51 = vld [vmem:[%s3631_s13 + $0x21] sm:$0xff] }
 0x107   : > { %2146 = vmatprep.mubr.f32.mxu0 %v3529_v0  ;;  %2259 = vmatprep.mubr.f32.mxu1 %v3529_v0 }
 0x108   : > { %v4085_v32 = vpop.f32.mrf.mxu0  ;;  %v4087_v40 = vpop.f32.mrf.mxu1 }
 0x10a   : > { %v4089_v41 = vpop.f32.mrf.mxu0  ;;  %v4091_v42 = vpop.f32.mrf.mxu1  ;;  %3315 = vmatmul.mubr.msk.f32.gmra.mxu0 %vm260_vm0, %v3307_v3  ;;  %3323 = vmatmul.mubr.msk.f32.gmra.mxu1 %vm260_vm0, %v3307_v3 }
 0x10b   : > { %2411 = vmatprep.mubr.f32.mxu0 %v3529_v0  ;;  %2524 = vmatprep.mubr.f32.mxu1 %v3529_v0 }
 0x10c   : > { %v4098_v8 = vpop.f32.mrf.mxu0  ;;  %v4100_v10 = vpop.f32.mrf.mxu1 }
 0x10e   : > { %v601_v9 = vpop.f32.mrf.mxu0  ;;  %v714_v13 = vpop.f32.mrf.mxu1  ;;  %3332 = vmatmul.mubr.msk.f32.vlgmr.msra.gmra.mxu0 %vm260_vm0, %v3324_v51  ;;  %3340 = vmatmul.mubr.msk.f32.vlgmr.msra.gmra.mxu1 %vm260_vm0, %v3324_v51 }
 0x10f   : > { %v4105_v14 = vadd.f32 %v601_v9, %v3990_v25  ;;  %v4108_v17 = vadd.f32 %v714_v13, %v3992_v26  ;;  %2679 = vmatpush1.msra.mxu0 %v2626_v11  ;;  %2792 = vmatpush1.msra.mxu1 %v2628_v12  ;;  %v2622_v25 = vld [vmem:[#allocation2 + $0x440] sm:$0xff]  ;;  %v2624_v26 = vld [vmem:[#allocation2 + $0x450] sm:$0xff] }
 0x110   : > { %v603_v20 = vpop.f32.mrf.mxu0  ;;  %v716_v19 = vpop.f32.mrf.mxu1  ;;  %2417 = vmatprep.mubr.f32.mxu0 %v3529_v0  ;;  %2530 = vmatprep.mubr.f32.mxu1 %v3529_v0 }
 0x111   : > { %v4114_v23 = vadd.f32 %v603_v20, %v3998_v30  ;;  %v4117_v24 = vadd.f32 %v716_v19, %v4000_v31  ;;  %2680 = vmatprep.subr.mxu0 %v2623_v15  ;;  %2793 = vmatprep.subr.mxu1 %v2625_v16  ;;  %v3326_v31 = vld [vmem:[%s3631_s13 + $0x41] sm:$0xff] }
 0x112   : > { %v607_v28 = vpop.f32.mrf.mxu0  ;;  %v720_v29 = vpop.f32.mrf.mxu1  ;;  %3333 = vmatmul.mubr.msk.f32.gmra.mxu0 %vm260_vm0, %v3325_v18  ;;  %3341 = vmatmul.mubr.msk.f32.gmra.mxu1 %vm260_vm0, %v3325_v18 }
 0x113   : > { %v4122_v53 = vadd.f32 %v607_v28, %v4004_v35  ;;  %v4125_v30 = vadd.f32 %v720_v29, %v4006_v36  ;;  %2423 = vmatprep.mubr.f32.mxu0 %v3529_v0  ;;  %2536 = vmatprep.mubr.f32.mxu1 %v3529_v0  ;;  %v2618_v35 = vld [vmem:[#allocation2 + $0x420] sm:$0xff]  ;;  %v2620_v36 = vld [vmem:[#allocation2 + $0x430] sm:$0xff] }
 0x114   : > { %v609_v38 = vpop.f32.mrf.mxu0  ;;  %v722_v44 = vpop.f32.mrf.mxu1  ;;  %2681 = vmatpush1.msra.mxu0 %v2622_v25  ;;  %2794 = vmatpush1.msra.mxu1 %v2624_v26 }
 0x115   : > { %v4131_v45 = vadd.f32 %v609_v38, %v4014_v39  ;;  %v4134_v58 = vadd.f32 %v722_v44, %v4016_v43  ;;  %2682 = vmatprep.subr.mxu0 %v2619_v33  ;;  %2795 = vmatprep.subr.mxu1 %v2621_v34  ;;  %v3327_v43 = vld [vmem:[%s3631_s13 + $0x51] sm:$0xff] }
 0x116   : > { %v613_v48 = vpop.f32.mrf.mxu0  ;;  %v726_v52 = vpop.f32.mrf.mxu1  ;;  %3334 = vmatmul.mubr.msk.f32.gmra.mxu0 %vm260_vm0, %v3326_v31  ;;  %3342 = vmatmul.mubr.msk.f32.gmra.mxu1 %vm260_vm0, %v3326_v31 }
 0x117   : > { %v4139_v57 = vadd.f32 %v613_v48, %v4018_v46  ;;  %v4142_v39 = vadd.f32 %v726_v52, %v4020_v47  ;;  %2429 = vmatprep.mubr.f32.mxu0 %v3529_v0  ;;  %2542 = vmatprep.mubr.f32.mxu1 %v3529_v0  ;;  %v2614_v46 = vld [vmem:[#allocation2 + $0x400] sm:$0xff]  ;;  %v2616_v47 = vld [vmem:[#allocation2 + $0x410] sm:$0xff] }
 0x118   : > { %v615_v3 = vpop.f32.mrf.mxu0  ;;  %v728_v51 = vpop.f32.mrf.mxu1  ;;  %2683 = vmatpush1.msra.mxu0 %v2618_v35  ;;  %2796 = vmatpush1.msra.mxu1 %v2620_v36 }
 0x119   : > { %v4148_v11 = vadd.f32 %v615_v3, %v4028_v49  ;;  %v4151_v12 = vadd.f32 %v728_v51, %v4030_v50  ;;  %2684 = vmatprep.subr.mxu0 %v2615_v54  ;;  %2797 = vmatprep.subr.mxu1 %v2617_v63  ;;  %v3328_v49 = vld [vmem:[%s3631_s13 + $0x61] sm:$0xff] }
 0x11a   : > { %v619_v9 = vpop.f32.mrf.mxu0  ;;  %v732_v13 = vpop.f32.mrf.mxu1  ;;  %3335 = vmatmul.mubr.msk.f32.gmra.mxu0 %vm260_vm0, %v3327_v43  ;;  %3343 = vmatmul.mubr.msk.f32.gmra.mxu1 %vm260_vm0, %v3327_v43 }
 0x11b   : > { %v4156_v15 = vadd.f32 %v619_v9, %v4032_v55  ;;  %v4159_v16 = vadd.f32 %v732_v13, %v4034_v56  ;;  %2435 = vmatprep.mubr.f32.mxu0 %v3529_v0  ;;  %2548 = vmatprep.mubr.f32.mxu1 %v3529_v0 }
 0x11c   : > { %v621_v50 = vpop.f32.mrf.mxu0  ;;  %v734_v18 = vpop.f32.mrf.mxu1  ;;  %2685 = vmatpush1.msra.mxu0 %v2614_v46  ;;  %2798 = vmatpush1.msra.mxu1 %v2616_v47 }
 0x11d   : > { %v4165_v20 = vadd.f32 %v621_v50, %v4042_v59  ;;  %v4168_v19 = vadd.f32 %v734_v18, %v4044_v60  ;;  %v3329_v59 = vld [vmem:[%s3631_s13 + $0x71] sm:$0xff] }
 0x11e   : > { %v625_v55 = vpop.f32.mrf.mxu0  ;;  %v738_v25 = vpop.f32.mrf.mxu1  ;;  %3336 = vmatmul.mubr.msk.f32.gmra.mxu0 %vm260_vm0, %v3328_v49  ;;  %3344 = vmatmul.mubr.msk.f32.gmra.mxu1 %vm260_vm0, %v3328_v49 }
 0x11f   : > { %v4173_v56 = vadd.f32 %v625_v55, %v4046_v22  ;;  %v4176_v26 = vadd.f32 %v738_v25, %v4048_v61  ;;  %2441 = vmatprep.mubr.f32.mxu0 %v3529_v0  ;;  %2554 = vmatprep.mubr.f32.mxu1 %v3529_v0 }
 0x120   : > { %v627_v28 = vpop.f32.mrf.mxu0  ;;  %v740_v60 = vpop.f32.mrf.mxu1 }
 0x121   : > { %v4182_v29 = vadd.f32 %v627_v28, %v4056_v1  ;;  %v4185_v33 = vadd.f32 %v740_v60, %v4058_v62 }
 0x122   : > { %v631_v34 = vpop.f32.mrf.mxu0  ;;  %v744_v31 = vpop.f32.mrf.mxu1  ;;  %3337 = vmatmul.mubr.msk.f32.gmra.mxu0 %vm260_vm0, %v3329_v59  ;;  %3345 = vmatmul.mubr.msk.f32.gmra.mxu1 %vm260_vm0, %v3329_v59 }
 0x123   : > { %v4190_v22 = vadd.f32 %v631_v34, %v4060_v4  ;;  %v4193_v61 = vadd.f32 %v744_v31, %v4062_v27  ;;  %2447 = vmatprep.mubr.f32.mxu0 %v3529_v0  ;;  %2560 = vmatprep.mubr.f32.mxu1 %v3529_v0 }
 0x124   : > { %v633_v1 = vpop.f32.mrf.mxu0  ;;  %v746_v62 = vpop.f32.mrf.mxu1 }
 0x125   : > { %v4198_v38 = vadd.f32 %v633_v1, %v4070_v2  ;;  %v4201_v44 = vadd.f32 %v746_v62, %v4072_v5  ;;  %v3331_v2 = vld [vmem:[%s3631_s13 + $0x91] sm:$0xff] }
 0x126   : > { %v637_v35 = vpop.f32.mrf.mxu0  ;;  %v750_v36 = vpop.f32.mrf.mxu1  ;;  %3338 = vmatmul.mubr.msk.f32.gmra.mxu0 %vm260_vm0, %v3931_v37  ;;  %3346 = vmatmul.mubr.msk.f32.gmra.mxu1 %vm260_vm0, %v3931_v37 }
 0x127   : > { %v4208_v4 = vadd.f32 %v637_v35, %v4074_v6  ;;  %v4211_v27 = vadd.f32 %v750_v36, %v4076_v7  ;;  %2453 = vmatprep.mubr.f32.mxu0 %v3529_v0  ;;  %2566 = vmatprep.mubr.f32.mxu1 %v3529_v0 }
 0x128   : > { %v639_v5 = vpop.f32.mrf.mxu0  ;;  %v752_v48 = vpop.f32.mrf.mxu1 }
 0x129   : > { %v4217_v52 = vadd.f32 %v639_v5, %v4085_v32  ;;  %v4220_v54 = vadd.f32 %v752_v48, %v4087_v40  ;;  %v3348_v32 = vld [vmem:[%s3631_s13 + $0x22] sm:$0xff] }
 0x12a   : > { %v643_v37 = vpop.f32.mrf.mxu0  ;;  %v756_v6 = vpop.f32.mrf.mxu1  ;;  %3339 = vmatmul.mubr.msk.f32.gmra.mxu0 %vm260_vm0, %v3331_v2  ;;  %3347 = vmatmul.mubr.msk.f32.gmra.mxu1 %vm260_vm0, %v3331_v2 }
 0x12b   : > { %v4225_v7 = vadd.f32 %v643_v37, %v4089_v41  ;;  %v4228_v63 = vadd.f32 %v756_v6, %v4091_v42  ;;  %2718 = vmatprep.mubr.f32.mxu0 %v3529_v0  ;;  %2831 = vmatprep.mubr.f32.mxu1 %v3529_v0 }
 0x12c   : > { %v645_v40 = vpop.f32.mrf.mxu0  ;;  %v758_v43 = vpop.f32.mrf.mxu1 }
 0x12d   : > { %v4234_v3 = vadd.f32 %v645_v40, %v4098_v8  ;;  %v4237_v51 = vadd.f32 %v758_v43, %v4100_v10  ;;  %v3349_v8 = vld [vmem:[%s3631_s13 + $0x32] sm:$0xff] }
 0x12e   : > { %v876_v46 = vpop.f32.mrf.mxu0  ;;  %v989_v41 = vpop.f32.mrf.mxu1  ;;  %3356 = vmatmul.mubr.msk.f32.vlgmr.msra.gmra.mxu0 %vm260_vm0, %v3348_v32  ;;  %3364 = vmatmul.mubr.msk.f32.vlgmr.msra.gmra.mxu1 %vm260_vm0, %v3348_v32 }
 0x12f   : > { %v4242_v42 = vadd.f32 %v876_v46, %v4105_v14  ;;  %v4245_v47 = vadd.f32 %v989_v41, %v4108_v17  ;;  %2724 = vmatprep.mubr.f32.mxu0 %v3529_v0  ;;  %2837 = vmatprep.mubr.f32.mxu1 %v3529_v0 }
 0x130   : > { %v878_v10 = vpop.f32.mrf.mxu0  ;;  %v991_v9 = vpop.f32.mrf.mxu1 }
 0x131   : > { %v4251_v13 = vadd.f32 %v878_v10, %v4114_v23  ;;  %v4254_v49 = vadd.f32 %v991_v9, %v4117_v24  ;;  %v3350_v23 = vld [vmem:[%s3631_s13 + $0x42] sm:$0xff] }
 0x132   : > { %v882_v50 = vpop.f32.mrf.mxu0  ;;  %v995_v14 = vpop.f32.mrf.mxu1  ;;  %3357 = vmatmul.mubr.msk.f32.gmra.mxu0 %vm260_vm0, %v3349_v8  ;;  %3365 = vmatmul.mubr.msk.f32.gmra.mxu1 %vm260_vm0, %v3349_v8 }
 0x133   : > { %v4259_v17 = vadd.f32 %v882_v50, %v4122_v53  ;;  %v4262_v18 = vadd.f32 %v995_v14, %v4125_v30  ;;  %2730 = vmatprep.mubr.f32.mxu0 %v3529_v0  ;;  %2843 = vmatprep.mubr.f32.mxu1 %v3529_v0 }
 0x134   : > { %v884_v24 = vpop.f32.mrf.mxu0  ;;  %v997_v55 = vpop.f32.mrf.mxu1 }
 0x135   : > { %v4268_v25 = vadd.f32 %v884_v24, %v4131_v45  ;;  %v4271_v59 = vadd.f32 %v997_v55, %v4134_v58  ;;  %v3351_v45 = vld [vmem:[%s3631_s13 + $0x52] sm:$0xff] }
 0x136   : > { %v888_v28 = vpop.f32.mrf.mxu0  ;;  %v1001_v53 = vpop.f32.mrf.mxu1  ;;  %3358 = vmatmul.mubr.msk.f32.gmra.mxu0 %vm260_vm0, %v3350_v23  ;;  %3366 = vmatmul.mubr.msk.f32.gmra.mxu1 %vm260_vm0, %v3350_v23 }
 0x137   : > { %v4276_v30 = vadd.f32 %v888_v28, %v4139_v57  ;;  %v4279_v60 = vadd.f32 %v1001_v53, %v4142_v39  ;;  %2736 = vmatprep.mubr.f32.mxu0 %v3529_v0  ;;  %2849 = vmatprep.mubr.f32.mxu1 %v3529_v0 }
 0x138   : > { %v890_v58 = vpop.f32.mrf.mxu0  ;;  %v1003_v34 = vpop.f32.mrf.mxu1 }
 0x139   : > { %v4285_v31 = vadd.f32 %v890_v58, %v4148_v11  ;;  %v4288_v1 = vadd.f32 %v1003_v34, %v4151_v12  ;;  %v3352_v11 = vld [vmem:[%s3631_s13 + $0x62] sm:$0xff] }
 0x13a   : > { %v894_v62 = vpop.f32.mrf.mxu0  ;;  %v1007_v57 = vpop.f32.mrf.mxu1  ;;  %3359 = vmatmul.mubr.msk.f32.gmra.mxu0 %vm260_vm0, %v3351_v45  ;;  %3367 = vmatmul.mubr.msk.f32.gmra.mxu1 %vm260_vm0, %v3351_v45 }
 0x13b   : > { %v4293_v39 = vadd.f32 %v894_v62, %v4156_v15  ;;  %v4296_v35 = vadd.f32 %v1007_v57, %v4159_v16  ;;  %2742 = vmatprep.mubr.f32.mxu0 %v3529_v0  ;;  %2855 = vmatprep.mubr.f32.mxu1 %v3529_v0 }
 0x13c   : > { %v896_v12 = vpop.f32.mrf.mxu0  ;;  %v1009_v36 = vpop.f32.mrf.mxu1 }
 0x13d   : > { %v4302_v2 = vadd.f32 %v896_v12, %v4165_v20  ;;  %v4305_v5 = vadd.f32 %v1009_v36, %v4168_v19  ;;  %v3353_v20 = vld [vmem:[%s3631_s13 + $0x72] sm:$0xff] }
 0x13e   : > { %v900_v48 = vpop.f32.mrf.mxu0  ;;  %v1013_v15 = vpop.f32.mrf.mxu1  ;;  %3360 = vmatmul.mubr.msk.f32.gmra.mxu0 %vm260_vm0, %v3352_v11  ;;  %3368 = vmatmul.mubr.msk.f32.gmra.mxu1 %vm260_vm0, %v3352_v11 }
 0x13f   : > { %v4310_v16 = vadd.f32 %v900_v48, %v4173_v56  ;;  %v4313_v37 = vadd.f32 %v1013_v15, %v4176_v26  ;;  %2748 = vmatprep.mubr.f32.mxu0 %v3529_v0  ;;  %2861 = vmatprep.mubr.f32.mxu1 %v3529_v0 }
 0x140   : > { %v902_v6 = vpop.f32.mrf.mxu0  ;;  %v1015_v19 = vpop.f32.mrf.mxu1 }
 0x141   : > { %v4319_v32 = vadd.f32 %v902_v6, %v4182_v29  ;;  %v4322_v40 = vadd.f32 %v1015_v19, %v4185_v33 }
 0x142   : > { %v906_v43 = vpop.f32.mrf.mxu0  ;;  %v1019_v46 = vpop.f32.mrf.mxu1  ;;  %3361 = vmatmul.mubr.msk.f32.gmra.mxu0 %vm260_vm0, %v3353_v20  ;;  %3369 = vmatmul.mubr.msk.f32.gmra.mxu1 %vm260_vm0, %v3353_v20 }
 0x143   : > { %v4327_v56 = vadd.f32 %v906_v43, %v4190_v22  ;;  %v4330_v26 = vadd.f32 %v1019_v46, %v4193_v61  ;;  %2754 = vmatprep.mubr.f32.mxu0 %v3529_v0  ;;  %2867 = vmatprep.mubr.f32.mxu1 %v3529_v0 }
 0x144   : > { %v908_v29 = vpop.f32.mrf.mxu0  ;;  %v1021_v33 = vpop.f32.mrf.mxu1 }
 0x145   : > { %v4335_v41 = vadd.f32 %v908_v29, %v4198_v38  ;;  %v4338_v8 = vadd.f32 %v1021_v33, %v4201_v44  ;;  %v3355_v38 = vld [vmem:[%s3631_s13 + $0x92] sm:$0xff] }
 0x146   : > { %v912_v10 = vpop.f32.mrf.mxu0  ;;  %v1025_v9 = vpop.f32.mrf.mxu1  ;;  %3362 = vmatmul.mubr.msk.f32.gmra.mxu0 %vm260_vm0, %v3982_v21  ;;  %3370 = vmatmul.mubr.msk.f32.gmra.mxu1 %vm260_vm0, %v3982_v21 }
 0x147   : > { %v4345_v22 = vadd.f32 %v912_v10, %v4208_v4  ;;  %v4348_v61 = vadd.f32 %v1025_v9, %v4211_v27  ;;  %2760 = vmatprep.mubr.f32.mxu0 %v3529_v0  ;;  %2873 = vmatprep.mubr.f32.mxu1 %v3529_v0 }
 0x148   : > { %v914_v44 = vpop.f32.mrf.mxu0  ;;  %v1027_v50 = vpop.f32.mrf.mxu1 }
 0x149   : > { %v4354_v14 = vadd.f32 %v914_v44, %v4217_v52  ;;  %v4357_v23 = vadd.f32 %v1027_v50, %v4220_v54 }
 0x14a   : > { %v918_v21 = vpop.f32.mrf.mxu0  ;;  %v1031_v24 = vpop.f32.mrf.mxu1  ;;  %3363 = vmatmul.mubr.msk.f32.gmra.mxu0 %vm260_vm0, %v3355_v38  ;;  %3371 = vmatmul.mubr.msk.f32.gmra.mxu1 %vm260_vm0, %v3355_v38 }
 0x14b   : > { %v4362_v4 = vadd.f32 %v918_v21, %v4225_v7  ;;  %v4365_v0 = vadd.f32 %v1031_v24, %v4228_v63 }
 0x14c   : > { %v920_v27 = vpop.f32.mrf.mxu0  ;;  %v1033_v55 = vpop.f32.mrf.mxu1 }
 0x14d   : > { %v4368_v52 = vadd.f32 %v920_v27, %v4234_v3  ;;  %v4371_v54 = vadd.f32 %v1033_v55, %v4237_v51 }
 0x14e   : > { %v1184_v28 = vpop.f32.mrf.mxu0  ;;  %v1297_v53 = vpop.f32.mrf.mxu1 }
 0x14f   : > { %v4374_v45 = vadd.f32 %v1184_v28, %v4242_v42  ;;  %v4377_v58 = vadd.f32 %v1297_v53, %v4245_v47 }
 0x150   : > { %v1186_v7 = vpop.f32.mrf.mxu0  ;;  %v1299_v34 = vpop.f32.mrf.mxu1 }
 0x151   : > { %v4380_v63 = vadd.f32 %v1186_v7, %v4251_v13  ;;  %v4383_v62 = vadd.f32 %v1299_v34, %v4254_v49 }
 0x152   : > { %v1190_v3 = vpop.f32.mrf.mxu0  ;;  %v1303_v57 = vpop.f32.mrf.mxu1 }
 0x153   : > { %v4386_v51 = vadd.f32 %v1190_v3, %v4259_v17  ;;  %v4389_v11 = vadd.f32 %v1303_v57, %v4262_v18 }
 0x154   : > { %v1192_v42 = vpop.f32.mrf.mxu0  ;;  %v1305_v12 = vpop.f32.mrf.mxu1 }
 0x155   : > { %v4392_v47 = vadd.f32 %v1192_v42, %v4268_v25  ;;  %v4395_v36 = vadd.f32 %v1305_v12, %v4271_v59 }
 0x156   : > { %v1196_v13 = vpop.f32.mrf.mxu0  ;;  %v1309_v48 = vpop.f32.mrf.mxu1 }
 0x157   : > { %v4398_v49 = vadd.f32 %v1196_v13, %v4276_v30  ;;  %v4401_v15 = vadd.f32 %v1309_v48, %v4279_v60 }
 0x158   : > { %v1198_v17 = vpop.f32.mrf.mxu0  ;;  %v1311_v20 = vpop.f32.mrf.mxu1 }
 0x159   : > { %v4404_v18 = vadd.f32 %v1198_v17, %v4285_v31  ;;  %v4407_v6 = vadd.f32 %v1311_v20, %v4288_v1 }
 0x15a   : > { %v1202_v25 = vpop.f32.mrf.mxu0  ;;  %v1315_v19 = vpop.f32.mrf.mxu1 }
 0x15b   : > { %v4410_v59 = vadd.f32 %v1202_v25, %v4293_v39  ;;  %v4413_v43 = vadd.f32 %v1315_v19, %v4296_v35 }
 0x15c   : > { %v1204_v30 = vpop.f32.mrf.mxu0  ;;  %v1317_v46 = vpop.f32.mrf.mxu1 }
 0x15d   : > { %v4416_v60 = vadd.f32 %v1204_v30, %v4302_v2  ;;  %v4419_v29 = vadd.f32 %v1317_v46, %v4305_v5 }
 0x15e   : > { %v1208_v31 = vpop.f32.mrf.mxu0  ;;  %v1321_v33 = vpop.f32.mrf.mxu1 }
 0x15f   : > { %v4422_v1 = vadd.f32 %v1208_v31, %v4310_v16  ;;  %v4425_v10 = vadd.f32 %v1321_v33, %v4313_v37 }
 0x160   : > { %v1210_v39 = vpop.f32.mrf.mxu0  ;;  %v1323_v9 = vpop.f32.mrf.mxu1 }
 0x161   : > { %v4428_v35 = vadd.f32 %v1210_v39, %v4319_v32  ;;  %v4431_v38 = vadd.f32 %v1323_v9, %v4322_v40 }
 0x162   : > { %v1214_v2 = vpop.f32.mrf.mxu0  ;;  %v1327_v44 = vpop.f32.mrf.mxu1 }
 0x163   : > { %v4434_v5 = vadd.f32 %v1214_v2, %v4327_v56  ;;  %v4437_v50 = vadd.f32 %v1327_v44, %v4330_v26 }
 0x164   : > { %v1216_v16 = vpop.f32.mrf.mxu0  ;;  %v1329_v21 = vpop.f32.mrf.mxu1 }
 0x165   : > { %v4440_v37 = vadd.f32 %v1216_v16, %v4335_v41  ;;  %v4443_v24 = vadd.f32 %v1329_v21, %v4338_v8 }
 0x166   : > { %v1220_v32 = vpop.f32.mrf.mxu0  ;;  %v1333_v27 = vpop.f32.mrf.mxu1 }
 0x167   : > { %v4446_v40 = vadd.f32 %v1220_v32, %v4345_v22  ;;  %v4449_v55 = vadd.f32 %v1333_v27, %v4348_v61 }
 0x168   : > { %v1222_v56 = vpop.f32.mrf.mxu0  ;;  %v1335_v28 = vpop.f32.mrf.mxu1 }
 0x169   : > { %v4452_v26 = vadd.f32 %v1222_v56, %v4354_v14  ;;  %v4455_v53 = vadd.f32 %v1335_v28, %v4357_v23 }
 0x16a   : > { %v1226_v41 = vpop.f32.mrf.mxu0  ;;  %v1339_v7 = vpop.f32.mrf.mxu1 }
 0x16b   : > { %v4458_v8 = vadd.f32 %v1226_v41, %v4362_v4  ;;  %v4461_v34 = vadd.f32 %v1339_v7, %v4365_v0 }
 0x16c   : > { %v1228_v22 = vpop.f32.mrf.mxu0  ;;  %v1341_v3 = vpop.f32.mrf.mxu1 }
 0x16d   : > { %v4464_v61 = vadd.f32 %v1228_v22, %v4368_v52  ;;  %v4467_v57 = vadd.f32 %v1341_v3, %v4371_v54 }
 0x16e   : > { %v1491_v14 = vpop.f32.mrf.mxu0  ;;  %v1604_v42 = vpop.f32.mrf.mxu1 }
 0x16f   : > { %v4470_v23 = vadd.f32 %v1491_v14, %v4374_v45  ;;  %v4473_v12 = vadd.f32 %v1604_v42, %v4377_v58 }
 0x170   : > { %v1493_v4 = vpop.f32.mrf.mxu0  ;;  %v1606_v13 = vpop.f32.mrf.mxu1 }
 0x171   : > { %v4476_v0 = vadd.f32 %v1493_v4, %v4380_v63  ;;  %v4479_v48 = vadd.f32 %v1606_v13, %v4383_v62 }
 0x172   : > { %v1497_v52 = vpop.f32.mrf.mxu0  ;;  %v1610_v17 = vpop.f32.mrf.mxu1 }
 0x173   : > { %v4482_v54 = vadd.f32 %v1497_v52, %v4386_v51  ;;  %v4485_v20 = vadd.f32 %v1610_v17, %v4389_v11 }
 0x174   : > { %v1499_v45 = vpop.f32.mrf.mxu0  ;;  %v1612_v25 = vpop.f32.mrf.mxu1 }
 0x175   : > { %v4488_v58 = vadd.f32 %v1499_v45, %v4392_v47  ;;  %v4491_v19 = vadd.f32 %v1612_v25, %v4395_v36 }
 0x176   : > { %v1503_v63 = vpop.f32.mrf.mxu0  ;;  %v1616_v30 = vpop.f32.mrf.mxu1 }
 0x177   : > { %v4494_v62 = vadd.f32 %v1503_v63, %v4398_v49  ;;  %v4497_v46 = vadd.f32 %v1616_v30, %v4401_v15 }
 0x178   : > { %v1505_v51 = vpop.f32.mrf.mxu0  ;;  %v1618_v31 = vpop.f32.mrf.mxu1 }
 0x179   : > { %v4500_v11 = vadd.f32 %v1505_v51, %v4404_v18  ;;  %v4503_v33 = vadd.f32 %v1618_v31, %v4407_v6 }
 0x17a   : > { %v1509_v47 = vpop.f32.mrf.mxu0  ;;  %v1622_v39 = vpop.f32.mrf.mxu1 }
 0x17b   : > { %v4506_v36 = vadd.f32 %v1509_v47, %v4410_v59  ;;  %v4509_v9 = vadd.f32 %v1622_v39, %v4413_v43 }
 0x17c   : > { %v1511_v49 = vpop.f32.mrf.mxu0  ;;  %v1624_v2 = vpop.f32.mrf.mxu1 }
 0x17d   : > { %v4512_v15 = vadd.f32 %v1511_v49, %v4416_v60  ;;  %v4515_v44 = vadd.f32 %v1624_v2, %v4419_v29 }
 0x17e   : > { %v1515_v18 = vpop.f32.mrf.mxu0  ;;  %v1628_v16 = vpop.f32.mrf.mxu1 }
 0x17f   : > { %v4518_v6 = vadd.f32 %v1515_v18, %v4422_v1  ;;  %v4521_v21 = vadd.f32 %v1628_v16, %v4425_v10 }
 0x180   : > { %v1517_v59 = vpop.f32.mrf.mxu0  ;;  %v1630_v32 = vpop.f32.mrf.mxu1 }
 0x181   : > { %v4524_v43 = vadd.f32 %v1517_v59, %v4428_v35  ;;  %v4527_v27 = vadd.f32 %v1630_v32, %v4431_v38 }
 0x182   : > { %v1521_v60 = vpop.f32.mrf.mxu0  ;;  %v1634_v56 = vpop.f32.mrf.mxu1 }
 0x183   : > { %v4530_v29 = vadd.f32 %v1521_v60, %v4434_v5  ;;  %v4533_v28 = vadd.f32 %v1634_v56, %v4437_v50 }
 0x184   : > { %v1523_v1 = vpop.f32.mrf.mxu0  ;;  %v1636_v41 = vpop.f32.mrf.mxu1 }
 0x185   : > { %v4536_v10 = vadd.f32 %v1523_v1, %v4440_v37  ;;  %v4539_v7 = vadd.f32 %v1636_v41, %v4443_v24 }
 0x186   : > { %v1527_v35 = vpop.f32.mrf.mxu0  ;;  %v1640_v22 = vpop.f32.mrf.mxu1 }
 0x187   : > { %v4542_v38 = vadd.f32 %v1527_v35, %v4446_v40  ;;  %v4545_v3 = vadd.f32 %v1640_v22, %v4449_v55 }
 0x188   : > { %v1529_v5 = vpop.f32.mrf.mxu0  ;;  %v1642_v14 = vpop.f32.mrf.mxu1 }
 0x189   : > { %v4548_v50 = vadd.f32 %v1529_v5, %v4452_v26  ;;  %v4551_v42 = vadd.f32 %v1642_v14, %v4455_v53 }
 0x18a   : > { %v1533_v37 = vpop.f32.mrf.mxu0  ;;  %v1646_v4 = vpop.f32.mrf.mxu1 }
 0x18b   : > { %v4554_v24 = vadd.f32 %v1533_v37, %v4458_v8  ;;  %v4557_v13 = vadd.f32 %v1646_v4, %v4461_v34 }
 0x18c   : > { %v1535_v40 = vpop.f32.mrf.mxu0  ;;  %v1648_v52 = vpop.f32.mrf.mxu1 }
 0x18d   : > { %v4560_v55 = vadd.f32 %v1535_v40, %v4464_v61  ;;  %v4563_v17 = vadd.f32 %v1648_v52, %v4467_v57 }
 0x18e   : > { %v1798_v26 = vpop.f32.mrf.mxu0  ;;  %v1911_v45 = vpop.f32.mrf.mxu1 }
 0x18f   : > { %v4566_v53 = vadd.f32 %v1798_v26, %v4470_v23  ;;  %v4569_v25 = vadd.f32 %v1911_v45, %v4473_v12 }
 0x190   : > { %v1800_v8 = vpop.f32.mrf.mxu0  ;;  %v1913_v63 = vpop.f32.mrf.mxu1 }
 0x191   : > { %v4572_v34 = vadd.f32 %v1800_v8, %v4476_v0  ;;  %v4575_v30 = vadd.f32 %v1913_v63, %v4479_v48 }
 0x192   : > { %v1804_v61 = vpop.f32.mrf.mxu0  ;;  %v1917_v51 = vpop.f32.mrf.mxu1 }
 0x193   : > { %v4578_v57 = vadd.f32 %v1804_v61, %v4482_v54  ;;  %v4581_v31 = vadd.f32 %v1917_v51, %v4485_v20 }
 0x194   : > { %v1806_v23 = vpop.f32.mrf.mxu0  ;;  %v1919_v47 = vpop.f32.mrf.mxu1 }
 0x195   : > { %v4584_v12 = vadd.f32 %v1806_v23, %v4488_v58  ;;  %v4587_v39 = vadd.f32 %v1919_v47, %v4491_v19 }
 0x196   : > { %v1810_v0 = vpop.f32.mrf.mxu0  ;;  %v1923_v49 = vpop.f32.mrf.mxu1 }
 0x197   : > { %v4590_v48 = vadd.f32 %v1810_v0, %v4494_v62  ;;  %v4593_v2 = vadd.f32 %v1923_v49, %v4497_v46 }
 0x198   : > { %v1812_v54 = vpop.f32.mrf.mxu0  ;;  %v1925_v18 = vpop.f32.mrf.mxu1 }
 0x199   : > { %v4596_v20 = vadd.f32 %v1812_v54, %v4500_v11  ;;  %v4599_v16 = vadd.f32 %v1925_v18, %v4503_v33 }
 0x19a   : > { %v1816_v58 = vpop.f32.mrf.mxu0  ;;  %v1929_v59 = vpop.f32.mrf.mxu1 }
 0x19b   : > { %v4602_v19 = vadd.f32 %v1816_v58, %v4506_v36  ;;  %v4605_v32 = vadd.f32 %v1929_v59, %v4509_v9 }
 0x19c   : > { %v1818_v62 = vpop.f32.mrf.mxu0  ;;  %v1931_v60 = vpop.f32.mrf.mxu1 }
 0x19d   : > { %v4608_v46 = vadd.f32 %v1818_v62, %v4512_v15  ;;  %v4611_v56 = vadd.f32 %v1931_v60, %v4515_v44 }
 0x19e   : > { %v1822_v11 = vpop.f32.mrf.mxu0  ;;  %v1935_v1 = vpop.f32.mrf.mxu1 }
 0x19f   : > { %v4614_v33 = vadd.f32 %v1822_v11, %v4518_v6  ;;  %v4617_v41 = vadd.f32 %v1935_v1, %v4521_v21 }
 0x1a0   : > { %v1824_v36 = vpop.f32.mrf.mxu0  ;;  %v1937_v35 = vpop.f32.mrf.mxu1 }
 0x1a1   : > { %v4620_v9 = vadd.f32 %v1824_v36, %v4524_v43  ;;  %v4623_v22 = vadd.f32 %v1937_v35, %v4527_v27 }
 0x1a2   : > { %v1828_v15 = vpop.f32.mrf.mxu0  ;;  %v1941_v5 = vpop.f32.mrf.mxu1 }
 0x1a3   : > { %v4626_v44 = vadd.f32 %v1828_v15, %v4530_v29  ;;  %v4629_v14 = vadd.f32 %v1941_v5, %v4533_v28 }
 0x1a4   : > { %v1830_v6 = vpop.f32.mrf.mxu0  ;;  %v1943_v37 = vpop.f32.mrf.mxu1 }
 0x1a5   : > { %v4632_v21 = vadd.f32 %v1830_v6, %v4536_v10  ;;  %v4635_v4 = vadd.f32 %v1943_v37, %v4539_v7 }
 0x1a6   : > { %v1834_v43 = vpop.f32.mrf.mxu0  ;;  %v1947_v40 = vpop.f32.mrf.mxu1 }
 0x1a7   : > { %v4638_v27 = vadd.f32 %v1834_v43, %v4542_v38  ;;  %v4641_v52 = vadd.f32 %v1947_v40, %v4545_v3 }
 0x1a8   : > { %v1836_v29 = vpop.f32.mrf.mxu0  ;;  %v1949_v26 = vpop.f32.mrf.mxu1 }
 0x1a9   : > { %5118 = vst [vmem:[#allocation8_spill] sm:$0xff] %v4638_v27  ;;  %5119 = vst [vmem:[#allocation9_spill] sm:$0xff] %v4641_v52  ;;  %v4644_v28 = vadd.f32 %v1836_v29, %v4548_v50  ;;  %v4647_v45 = vadd.f32 %v1949_v26, %v4551_v42 }
 0x1aa   : > { %v1840_v10 = vpop.f32.mrf.mxu0  ;;  %v1953_v8 = vpop.f32.mrf.mxu1 }
 0x1ab   : > { %5120 = vst [vmem:[#allocation10_spill] sm:$0xff] %v4644_v28  ;;  %5121 = vst [vmem:[#allocation11_spill] sm:$0xff] %v4647_v45  ;;  %v4650_v7 = vadd.f32 %v1840_v10, %v4554_v24  ;;  %v4653_v63 = vadd.f32 %v1953_v8, %v4557_v13 }
 0x1ac   : > { %v1842_v38 = vpop.f32.mrf.mxu0  ;;  %v1955_v61 = vpop.f32.mrf.mxu1 }
 0x1ad   : > { %5122 = vst [vmem:[#allocation12_spill] sm:$0xff] %v4650_v7  ;;  %5123 = vst [vmem:[#allocation13_spill] sm:$0xff] %v4653_v63  ;;  %v4656_v3 = vadd.f32 %v1842_v38, %v4560_v55  ;;  %v4659_v51 = vadd.f32 %v1955_v61, %v4563_v17 }
 0x1ae   : > { %v4661_v50 = vpop.f32.mrf.mxu0  ;;  %v4663_v42 = vpop.f32.mrf.mxu1 }
 0x1af   : > { %5124 = vst [vmem:[#allocation14_spill] sm:$0xff] %v4656_v3  ;;  %5125 = vst [vmem:[#allocation15_spill] sm:$0xff] %v4659_v51 }
 0x1b0   : > { %v4665_v23 = vpop.f32.mrf.mxu0  ;;  %v4667_v47 = vpop.f32.mrf.mxu1 }
 0x1b2   : > { %v4669_v24 = vpop.f32.mrf.mxu0  ;;  %v4671_v13 = vpop.f32.mrf.mxu1 }
 0x1b4   : > { %v4673_v0 = vpop.f32.mrf.mxu0  ;;  %v4675_v49 = vpop.f32.mrf.mxu1 }
 0x1b6   : > { %v4677_v55 = vpop.f32.mrf.mxu0  ;;  %v4679_v17 = vpop.f32.mrf.mxu1 }
 0x1b8   : > { %v4681_v54 = vpop.f32.mrf.mxu0  ;;  %v4683_v18 = vpop.f32.mrf.mxu1 }
 0x1ba   : > { %v4685_v58 = vpop.f32.mrf.mxu0  ;;  %v4687_v59 = vpop.f32.mrf.mxu1 }
 0x1bc   : > { %v4689_v62 = vpop.f32.mrf.mxu0  ;;  %v4691_v60 = vpop.f32.mrf.mxu1 }
 0x1be   : > { %v4693_v11 = vpop.f32.mrf.mxu0  ;;  %v4695_v1 = vpop.f32.mrf.mxu1 }
 0x1c0   : > { %v4697_v36 = vpop.f32.mrf.mxu0  ;;  %v4699_v35 = vpop.f32.mrf.mxu1 }
 0x1c2   : > { %v4701_v15 = vpop.f32.mrf.mxu0  ;;  %v4703_v5 = vpop.f32.mrf.mxu1 }
 0x1c4   : > { %v4705_v6 = vpop.f32.mrf.mxu0  ;;  %v4707_v37 = vpop.f32.mrf.mxu1 }
 0x1c5   : > { %5126 = vst [vmem:[#allocation16_spill] sm:$0xff] %v4707_v37 }
 0x1c6   : > { %v4709_v43 = vpop.f32.mrf.mxu0  ;;  %v4711_v40 = vpop.f32.mrf.mxu1 }
 0x1c7   : > { %5127 = vst [vmem:[#allocation17_spill] sm:$0xff] %v4709_v43  ;;  %5128 = vst [vmem:[#allocation18_spill] sm:$0xff] %v4711_v40 }
 0x1c8   : > { %v4713_v29 = vpop.f32.mrf.mxu0  ;;  %v4715_v26 = vpop.f32.mrf.mxu1 }
 0x1c9   : > { %5129 = vst [vmem:[#allocation19_spill] sm:$0xff] %v4713_v29  ;;  %5130 = vst [vmem:[#allocation20_spill] sm:$0xff] %v4715_v26 }
 0x1ca   : > { %v4717_v10 = vpop.f32.mrf.mxu0  ;;  %v4719_v8 = vpop.f32.mrf.mxu1 }
 0x1cb   : > { %5131 = vst [vmem:[#allocation21_spill] sm:$0xff] %v4717_v10  ;;  %5132 = vst [vmem:[#allocation22_spill] sm:$0xff] %v4719_v8  ;;  %v2914_v8 = vlaneseq }
 0x1cc   : > { %v4721_v38 = vpop.f32.mrf.mxu0  ;;  %v4723_v61 = vpop.f32.mrf.mxu1 }
 0x1cd   : > { %5133 = vst [vmem:[#allocation23_spill] sm:$0xff] %v4721_v38  ;;  %5134 = vst [vmem:[#allocation24_spill] sm:$0xff] %v4723_v61 }
 0x1ce   : > { %v4725_v51 = vpop.f32.mrf.mxu0  ;;  %v4727_v3 = vpop.f32.mrf.mxu1 }
 0x1cf   : > { %5135 = vst [vmem:[#allocation25_spill] sm:$0xff] %v4725_v51  ;;  %5136 = vst [vmem:[#allocation26_spill] sm:$0xff] %v4727_v3 }
 0x1d0   : > { %v4729_v63 = vpop.f32.mrf.mxu0  ;;  %v4731_v7 = vpop.f32.mrf.mxu1 }
 0x1d1   : > { %5137 = vst [vmem:[#allocation27_spill] sm:$0xff] %v4729_v63  ;;  %5138 = vst [vmem:[#allocation28_spill] sm:$0xff] %v4731_v7  ;;  %v2915_v63 = vshrl.u32 %v2914_v8, 7 }
 0x1d2   : > { %v4733_v45 = vpop.f32.mrf.mxu0  ;;  %v4735_v29 = vpop.f32.mrf.mxu1 }
 0x1d3   : > { %5139 = vst [vmem:[#allocation29_spill] sm:$0xff] %v4733_v45  ;;  %5140 = vst [vmem:[#allocation30_spill] sm:$0xff] %v4735_v29  ;;  %v2928_v8 = vsub.s32 3, %v2915_v63 }
 0x1d4   : > { %v4737_v26 = vpop.f32.mrf.mxu0  ;;  %v4739_v10 = vpop.f32.mrf.mxu1 }
 0x1d5   : > { %5141 = vst [vmem:[#allocation31_spill] sm:$0xff] %v4737_v26  ;;  %5142 = vst [vmem:[#allocation32_spill] sm:$0xff] %v4739_v10  ;;  %v2916_v26 = vsub.s32 0, %v2915_v63  ;;  %v2924_v10 = vsub.s32 2, %v2915_v63 }
 0x1d6   : > { %v4741_v38 = vpop.f32.mrf.mxu0  ;;  %v4743_v61 = vpop.f32.mrf.mxu1 }
 0x1d7   : > { %5143 = vst [vmem:[#allocation33_spill] sm:$0xff] %v4741_v38  ;;  %5144 = vst [vmem:[#allocation34_spill] sm:$0xff] %v4743_v61  ;;  %v2912_v38 = vld [vmem:[%s5106_s2] sm:$0xf] }
 0x1d8   : > { %v4745_v51 = vpop.f32.mrf.mxu0  ;;  %v4747_v3 = vpop.f32.mrf.mxu1  ;;  %v4775_v52 = vrot.slane %v2912_v38, %v2924_v10 }
 0x1d9   : > { %5145 = vst [vmem:[#allocation35_spill] sm:$0xff] %v4745_v51  ;;  %5146 = vst [vmem:[#allocation36_spill] sm:$0xff] %v4747_v3  ;;  %v2966_v51 = vld [vmem:[%s5107_s3] sm:$0xf]  ;;  %v2920_v3 = vsub.s32 1, %v2915_v63  ;;  %v4783_v63 = vrot.slane %v2912_v38, %v2928_v8 }
 0x1da   : > { %v4749_v28 = vpop.f32.mrf.mxu0  ;;  %v4751_v7 = vpop.f32.mrf.mxu1  ;;  %v4773_v40 = vrot.slane %v2966_v51, %v2916_v26  ;;  %v4777_v43 = vrot.slane %v2966_v51, %v2924_v10  ;;  %v2269_v10 = vadd.f32 %v4667_v47, %v4575_v30  ;;  %v2276_v30 = vadd.f32 %v4679_v17, %v4593_v2  ;;  %v5164_v17 = vld [vmem:[#allocation10_spill] sm:$0xff] }
 0x1db   : > { %5147 = vst [vmem:[#allocation37_spill] sm:$0xff] %v4749_v28  ;;  %5148 = vst [vmem:[#allocation38_spill] sm:$0xff] %v4751_v7  ;;  %v4779_v27 = vrot.slane %v2912_v38, %v2920_v3  ;;  %v4781_v37 = vrot.slane %v2966_v51, %v2920_v3  ;;  %v2281_v2 = vadd.f32 %v4691_v60, %v4611_v56  ;;  %v5168_v60 = vld [vmem:[#allocation12_spill] sm:$0xff] }
 0x1dc   : > { %v4753_v45 = vpop.f32.mrf.mxu0  ;;  %v4755_v29 = vpop.f32.mrf.mxu1  ;;  %5154 = vst [vmem:[#allocation44_spill] sm:$0xff] %v4777_v43  ;;  %5157 = vst [vmem:[#allocation47_spill] sm:$0xff] %v4783_v63  ;;  %v2288_v56 = vadd.f32 %v4703_v5, %v4629_v14  ;;  %v5181_v63 = vld [vmem:[#allocation30_spill] sm:$0xff] }
 0x1dd   : > { %5149 = vst [vmem:[#allocation39_spill] sm:$0xff] %v4753_v45  ;;  %5150 = vst [vmem:[#allocation40_spill] sm:$0xff] %v4755_v29  ;;  %v4771_v29 = vrot.slane %v2912_v38, %v2916_v26  ;;  %v2267_v26 = vadd.f32 %v4665_v23, %v4572_v34  ;;  %v2272_v38 = vadd.f32 %v4671_v13, %v4581_v31  ;;  %v5160_v13 = vld [vmem:[#allocation8_spill] sm:$0xff] }
 0x1de   : > { %v4763_v61 = vpop.f32.mrf.mxu0  ;;  %v4765_v28 = vpop.f32.mrf.mxu1  ;;  %5155 = vst [vmem:[#allocation45_spill] sm:$0xff] %v4779_v27  ;;  %5156 = vst [vmem:[#allocation46_spill] sm:$0xff] %v4781_v37  ;;  %v2274_v34 = vadd.f32 %v4677_v55, %v4590_v48  ;;  %v2279_v48 = vadd.f32 %v4689_v62, %v4608_v46  ;;  %v2283_v23 = vadd.f32 %v4697_v36, %v4620_v9  ;;  %v5163_v55 = vld [vmem:[#allocation18_spill] sm:$0xff] }
 0x1df   : > { %5151 = vst [vmem:[#allocation41_spill] sm:$0xff] %v4763_v61  ;;  %5153 = vst [vmem:[#allocation43_spill] sm:$0xff] %v4771_v29  ;;  %v4785_v61 = vrot.slane %v2966_v51, %v2928_v8  ;;  %v2268_v29 = vadd.f32 %v4663_v42, %v4569_v25  ;;  %v2270_v51 = vadd.f32 %v4669_v24, %v4578_v57  ;;  %v5159_v24 = vld [vmem:[#allocation16_spill] sm:$0xff]  ;;  %v5171_v36 = vld [vmem:[#allocation22_spill] sm:$0xff] }
 0x1e0   : > { %v4767_v7 = vpop.f32.mrf.mxu0  ;;  %v4769_v45 = vpop.f32.mrf.mxu1  ;;  %v2273_v25 = vadd.f32 %v4675_v49, %v4587_v39  ;;  %v2277_v57 = vadd.f32 %v4683_v18, %v4599_v16  ;;  %v2280_v39 = vadd.f32 %v4687_v59, %v4605_v32  ;;  %v2284_v16 = vadd.f32 %v4695_v1, %v4617_v41  ;;  %v5162_v49 = vld [vmem:[#allocation9_spill] sm:$0xff]  ;;  %v5175_v8 = vld [vmem:[#allocation24_spill] sm:$0xff] }
 0x1e1   : > { %5152 = vst [vmem:[#allocation42_spill] sm:$0xff] %v4767_v7  ;;  %5158 = vst [vmem:[#allocation48_spill] sm:$0xff] %v4785_v61  ;;  %v2266_v7 = vadd.f32 %v4661_v50, %v4566_v53  ;;  %v2271_v53 = vadd.f32 %v4673_v0, %v4584_v12  ;;  %v2275_v50 = vadd.f32 %v4681_v54, %v4596_v20  ;;  %v5161_v0 = vld [vmem:[#allocation17_spill] sm:$0xff]  ;;  %v5165_v54 = vld [vmem:[#allocation19_spill] sm:$0xff] }
 0x1e2   : > { %v4795_v43 = vpop.f32.mrf.mxu0  ;;  %v4797_v3 = vpop.f32.mrf.mxu1  ;;  %v2278_v12 = vadd.f32 %v4685_v58, %v4602_v19  ;;  %v2282_v20 = vadd.f32 %v4693_v11, %v4614_v33  ;;  %v2285_v19 = vadd.f32 %v4699_v35, %v4623_v22  ;;  %v2286_v46 = vadd.f32 %v4701_v15, %v4626_v44  ;;  %v5166_v58 = vld [vmem:[#allocation11_spill] sm:$0xff]  ;;  %v5167_v44 = vld [vmem:[#allocation20_spill] sm:$0xff]  ;;  %v5169_v11 = vld [vmem:[#allocation21_spill] sm:$0xff] }
 0x1e3   : > { %v2287_v33 = vadd.f32 %v4705_v6, %v4632_v21  ;;  %v2289_v41 = vadd.f32 %v5159_v24, %v4635_v4  ;;  %v2290_v9 = vadd.f32 %v5161_v0, %v5160_v13  ;;  %v2292_v22 = vadd.f32 %v5163_v55, %v5162_v49  ;;  %v5170_v1 = vld [vmem:[#allocation13_spill] sm:$0xff]  ;;  %v5172_v35 = vld [vmem:[#allocation14_spill] sm:$0xff]  ;;  %v5173_v15 = vld [vmem:[#allocation23_spill] sm:$0xff] }
 0x1e4   : > { %v2445_v42 = vpop.f32.mrf.mxu0  ;;  %v2558_v31 = vpop.f32.mrf.mxu1  ;;  %v2291_v18 = vadd.f32 %v5165_v54, %v5164_v17  ;;  %v2293_v59 = vadd.f32 %v5167_v44, %v5166_v58  ;;  %v2294_v21 = vadd.f32 %v5169_v11, %v5168_v60  ;;  %v2296_v4 = vadd.f32 %v5171_v36, %v5170_v1  ;;  %v5174_v6 = vld [vmem:[#allocation15_spill] sm:$0xff]  ;;  %v5176_v13 = vld [vmem:[#allocation25_spill] sm:$0xff]  ;;  %v5177_v49 = vld [vmem:[#allocation26_spill] sm:$0xff] }
 0x1e5   : > { %v2295_v5 = vadd.f32 %v5173_v15, %v5172_v35  ;;  %v2297_v24 = vadd.f32 %v5175_v8, %v5174_v6  ;;  %v2573_v0 = vadd.f32 %v5176_v13, %v2266_v7  ;;  %v2575_v55 = vadd.f32 %v5177_v49, %v2268_v29  ;;  %v5178_v17 = vld [vmem:[#allocation27_spill] sm:$0xff]  ;;  %v5179_v58 = vld [vmem:[#allocation28_spill] sm:$0xff]  ;;  %v5180_v60 = vld [vmem:[#allocation29_spill] sm:$0xff] }
 0x1e6   : > { %v2449_v47 = vpop.f32.mrf.mxu0  ;;  %v2562_v32 = vpop.f32.mrf.mxu1  ;;  %v2574_v54 = vadd.f32 %v5178_v17, %v2267_v26  ;;  %v2576_v44 = vadd.f32 %v5179_v58, %v2269_v10  ;;  %v2577_v11 = vadd.f32 %v5180_v60, %v2270_v51  ;;  %v2579_v1 = vadd.f32 %v5181_v63, %v2272_v38  ;;  %v5182_v36 = vld [vmem:[#allocation31_spill] sm:$0xff]  ;;  %v5183_v35 = vld [vmem:[#allocation32_spill] sm:$0xff]  ;;  %v5184_v6 = vld [vmem:[#allocation33_spill] sm:$0xff] }
 0x1e7   : > { %v2578_v27 = vadd.f32 %v5182_v36, %v2271_v53  ;;  %v2580_v15 = vadd.f32 %v5183_v35, %v2273_v25  ;;  %v4864_v8 = vadd.f32 %v5184_v6, %v2274_v34  ;;  %v5185_v7 = vld [vmem:[#allocation34_spill] sm:$0xff]  ;;  %v5186_v26 = vld [vmem:[#allocation35_spill] sm:$0xff]  ;;  %v5187_v10 = vld [vmem:[#allocation36_spill] sm:$0xff] }
 0x1e8   : > { %v2451_v62 = vpop.f32.mrf.mxu0  ;;  %v2564_v14 = vpop.f32.mrf.mxu1  ;;  %v4867_v29 = vadd.f32 %v5185_v7, %v2276_v30  ;;  %v4870_v13 = vadd.f32 %v5186_v26, %v2275_v50  ;;  %v4873_v49 = vadd.f32 %v5187_v10, %v2277_v57  ;;  %v5188_v63 = vld [vmem:[#allocation37_spill] sm:$0xff]  ;;  %v5189_v53 = vld [vmem:[#allocation38_spill] sm:$0xff]  ;;  %v5190_v25 = vld [vmem:[#allocation39_spill] sm:$0xff]  ;;  %v4891_v57 = vadd.f32 %v4765_v28, %v2284_v16 }
 0x1e9   : > { %v4876_v38 = vadd.f32 %v5188_v63, %v2278_v12  ;;  %v4879_v58 = vadd.f32 %v5189_v53, %v2280_v39  ;;  %v4882_v34 = vadd.f32 %v5190_v25, %v2279_v48  ;;  %v5191_v60 = vld [vmem:[#allocation40_spill] sm:$0xff]  ;;  %v5192_v36 = vld [vmem:[#allocation41_spill] sm:$0xff]  ;;  %v5193_v35 = vld [vmem:[#allocation42_spill] sm:$0xff]  ;;  %v4897_v12 = vadd.f32 %v4769_v45, %v2285_v19 }
 0x1ea   : > { %v2455_v61 = vpop.f32.mrf.mxu0  ;;  %v2568_v37 = vpop.f32.mrf.mxu1  ;;  %v4885_v30 = vadd.f32 %v5191_v60, %v2281_v2  ;;  %v4888_v50 = vadd.f32 %v5192_v36, %v2282_v20  ;;  %v4894_v6 = vadd.f32 %v5193_v35, %v2283_v23  ;;  %v4901_v7 = vadd.f32 %v4795_v43, %v2286_v46  ;;  %v5194_v43 = vld [vmem:[#allocation43_spill] sm:$0xff]  ;;  %v5196_v63 = vld [vmem:[#allocation45_spill] sm:$0xff]  ;;  %v5199_v36 = vld [vmem:[#allocation48_spill] sm:$0xff] }
 0x1eb   : > { %v4904_v2 = vadd.f32 %v4797_v3, %v2288_v56  ;;  %v4906_v28 = vadd.f32 %v2445_v42, %v2287_v33  ;;  %v4908_v16 = vadd.f32 %v2558_v31, %v2289_v41  ;;  %v4910_v23 = vadd.f32 %v2449_v47, %v2290_v9  ;;  %v5195_v9 = vld [vmem:[#allocation44_spill] sm:$0xff]  ;;  %v5197_v25 = vld [vmem:[#allocation47_spill] sm:$0xff] }
 0x1ec   : > { %v2457_v51 = vpop.f32.mrf.mxu0  ;;  %v2570_v17 = vpop.f32.mrf.mxu1  ;;  %v4912_v10 = vadd.f32 %v2562_v32, %v2292_v22  ;;  %v4922_v42 = vadd.f32 %v2564_v14, %v2293_v59  ;;  %v4924_v31 = vadd.f32 %v2455_v61, %v2294_v21  ;;  %v4926_v47 = vadd.f32 %v2568_v37, %v2296_v4  ;;  %v5198_v4 = vld [vmem:[#allocation46_spill] sm:$0xff] }
 0x1ee   : > { %v2720_v39 = vpop.f32.mrf.mxu0  ;;  %v2833_v48 = vpop.f32.mrf.mxu1 }
 0x1ef   : > { %v2880_v20 = vadd.f32 %v2720_v39, %v2573_v0  ;;  %v2882_v26 = vadd.f32 %v2833_v48, %v2575_v55  ;;  %v4920_v55 = vadd.f32 %v2451_v62, %v2291_v18  ;;  %v4934_v18 = vadd.f32 %v2570_v17, %v2297_v24 }
 0x1f0   : > { %v2722_v45 = vpop.f32.mrf.mxu0  ;;  %v2835_v19 = vpop.f32.mrf.mxu1 }
 0x1f1   : > { %v2934_v46 = vmul.f32 %v5194_v43, %v2880_v20  ;;  %v2936_v3 = vmul.f32 %v4775_v52, %v2882_v26  ;;  %v2881_v56 = vadd.f32 %v2722_v45, %v2574_v54  ;;  %v2883_v0 = vadd.f32 %v2835_v19, %v2576_v44 }
 0x1f2   : > { %v2726_v32 = vpop.f32.mrf.mxu0  ;;  %v2839_v33 = vpop.f32.mrf.mxu1  ;;  %v4932_v54 = vadd.f32 %v2457_v51, %v2295_v5 }
 0x1f3   : > { %v2988_v41 = vadd.f32 %v4773_v40, %v2934_v46  ;;  %v2990_v22 = vadd.f32 %v5195_v9, %v2936_v3  ;;  %v2935_v53 = vmul.f32 %v5196_v63, %v2881_v56  ;;  %v2937_v60 = vmul.f32 %v5197_v25, %v2883_v0 }
 0x1f4   : > { %v2884_v59 = vadd.f32 %v2726_v32, %v2577_v11  ;;  %v2886_v61 = vadd.f32 %v2839_v33, %v2579_v1  ;;  %v2728_v62 = vpop.f32.mrf.mxu0  ;;  %v2841_v37 = vpop.f32.mrf.mxu1 }
 0x1f5   : > { %v3020_v14 = vmax.f32 %v2988_v41, 0.0  ;;  %v3022_v21 = vmax.f32 %v2990_v22, 0.0  ;;  %v2989_v44 = vadd.f32 %v5198_v4, %v2935_v53  ;;  %v2991_v35 = vadd.f32 %v5199_v36, %v2937_v60 }
 0x1f6   : > { %v2938_v39 = vmul.f32 %v5194_v43, %v2884_v59  ;;  %v2940_v48 = vmul.f32 %v4775_v52, %v2886_v61  ;;  %v2885_v20 = vadd.f32 %v2728_v62, %v2578_v27  ;;  %v2887_v5 = vadd.f32 %v2841_v37, %v2580_v15  ;;  %v2732_v51 = vpop.f32.mrf.mxu0  ;;  %v2845_v26 = vpop.f32.mrf.mxu1 }
 0x1f7   : > { %3052 = vst [vmem:[%s4941_s29] sm:$0xff] %v3020_v14  ;;  %3054 = vst [vmem:[%s4941_s29 + $0x10] sm:$0xff] %v3022_v21  ;;  %v3021_v24 = vmax.f32 %v2989_v44, 0.0  ;;  %v3023_v11 = vmax.f32 %v2991_v35, 0.0  ;;  %v2888_v1 = vadd.f32 %v2732_v51, %v4864_v8  ;;  %v2890_v17 = vadd.f32 %v2845_v26, %v4867_v29 }
 0x1f8   : > { %v2992_v45 = vadd.f32 %v4773_v40, %v2938_v39  ;;  %v2994_v27 = vadd.f32 %v5195_v9, %v2940_v48  ;;  %v2939_v15 = vmul.f32 %v5196_v63, %v2885_v20  ;;  %v2941_v19 = vmul.f32 %v5197_v25, %v2887_v5  ;;  %v2734_v46 = vpop.f32.mrf.mxu0  ;;  %v2847_v3 = vpop.f32.mrf.mxu1 }
 0x1f9   : > { %3053 = vst [vmem:[%s4941_s29 + $0x8] sm:$0xff] %v3021_v24  ;;  %3055 = vst [vmem:[%s4941_s29 + $0x18] sm:$0xff] %v3023_v11  ;;  %v2942_v56 = vmul.f32 %v5194_v43, %v2888_v1  ;;  %v2944_v8 = vmul.f32 %v4775_v52, %v2890_v17  ;;  %v2889_v29 = vadd.f32 %v2734_v46, %v4870_v13 }
 0x1fa   : > { %v2891_v0 = vadd.f32 %v2847_v3, %v4873_v49  ;;  %v3024_v32 = vmax.f32 %v2992_v45, 0.0  ;;  %v3026_v33 = vmax.f32 %v2994_v27, 0.0  ;;  %v2993_v41 = vadd.f32 %v5198_v4, %v2939_v15  ;;  %v2738_v53 = vpop.f32.mrf.mxu0  ;;  %v2851_v60 = vpop.f32.mrf.mxu1 }
 0x1fb   : > { %v2995_v22 = vadd.f32 %v5199_v36, %v2941_v19  ;;  %v2996_v59 = vadd.f32 %v4773_v40, %v2942_v56  ;;  %v2998_v61 = vadd.f32 %v5195_v9, %v2944_v8  ;;  %v2943_v62 = vmul.f32 %v5196_v63, %v2889_v29 }
 0x1fc   : > { %v2945_v13 = vmul.f32 %v5197_v25, %v2891_v0  ;;  %3056 = vst [vmem:[%s4941_s29 + $0x20] sm:$0xff] %v3024_v32  ;;  %3058 = vst [vmem:[%s4941_s29 + $0x30] sm:$0xff] %v3026_v33  ;;  %v3025_v49 = vmax.f32 %v2993_v41, 0.0  ;;  %v2892_v14 = vadd.f32 %v2738_v53, %v4876_v38  ;;  %v2894_v21 = vadd.f32 %v2851_v60, %v4879_v58  ;;  %v2740_v44 = vpop.f32.mrf.mxu0  ;;  %v2853_v35 = vpop.f32.mrf.mxu1 }
 0x1fd   : > { %v3027_v37 = vmax.f32 %v2995_v22, 0.0  ;;  %v3028_v39 = vmax.f32 %v2996_v59, 0.0  ;;  %v3030_v48 = vmax.f32 %v2998_v61, 0.0  ;;  %v2997_v20 = vadd.f32 %v5198_v4, %v2943_v62 }
 0x1fe   : > { %v2999_v5 = vadd.f32 %v5199_v36, %v2945_v13  ;;  %3057 = vst [vmem:[%s4941_s29 + $0x28] sm:$0xff] %v3025_v49  ;;  %v2946_v51 = vmul.f32 %v5194_v43, %v2892_v14  ;;  %v2948_v26 = vmul.f32 %v4775_v52, %v2894_v21  ;;  %v2893_v38 = vadd.f32 %v2740_v44, %v4882_v34  ;;  %v2744_v24 = vpop.f32.mrf.mxu0  ;;  %v2857_v11 = vpop.f32.mrf.mxu1 }
 0x1ff   : > { %3059 = vst [vmem:[%s4941_s29 + $0x38] sm:$0xff] %v3027_v37  ;;  %v2895_v58 = vadd.f32 %v2853_v35, %v4885_v30  ;;  %3060 = vst [vmem:[%s4941_s29 + $0x40] sm:$0xff] %v3028_v39  ;;  %v3029_v1 = vmax.f32 %v2997_v20, 0.0  ;;  %v2896_v45 = vadd.f32 %v2744_v24, %v4888_v50  ;;  %v2898_v27 = vadd.f32 %v2857_v11, %v4891_v57 }
 0x200   : > { %3062 = vst [vmem:[%s4941_s29 + $0x50] sm:$0xff] %v3030_v48  ;;  %v3031_v17 = vmax.f32 %v2999_v5, 0.0  ;;  %v3000_v15 = vadd.f32 %v4773_v40, %v2946_v51  ;;  %v3002_v19 = vadd.f32 %v5195_v9, %v2948_v26  ;;  %v2947_v34 = vmul.f32 %v5196_v63, %v2893_v38  ;;  %v2746_v30 = vpop.f32.mrf.mxu0  ;;  %v2859_v3 = vpop.f32.mrf.mxu1 }
 0x201   : > { %v2949_v46 = vmul.f32 %v5197_v25, %v2895_v58  ;;  %3061 = vst [vmem:[%s4941_s29 + $0x48] sm:$0xff] %v3029_v1  ;;  %v2950_v56 = vmul.f32 %v5194_v43, %v2896_v45  ;;  %v2952_v50 = vmul.f32 %v4775_v52, %v2898_v27  ;;  %v2897_v57 = vadd.f32 %v2746_v30, %v4894_v6 }
 0x202   : > { %3063 = vst [vmem:[%s4941_s29 + $0x58] sm:$0xff] %v3031_v17  ;;  %v2899_v8 = vadd.f32 %v2859_v3, %v4897_v12  ;;  %v3032_v29 = vmax.f32 %v3000_v15, 0.0  ;;  %v3034_v0 = vmax.f32 %v3002_v19, 0.0  ;;  %v3001_v32 = vadd.f32 %v5198_v4, %v2947_v34  ;;  %v2750_v41 = vpop.f32.mrf.mxu0  ;;  %v2863_v22 = vpop.f32.mrf.mxu1 }
 0x203   : > { %v3003_v33 = vadd.f32 %v5199_v36, %v2949_v46  ;;  %v3004_v53 = vadd.f32 %v4773_v40, %v2950_v56  ;;  %v3006_v60 = vadd.f32 %v5195_v9, %v2952_v50  ;;  %v2951_v59 = vmul.f32 %v5196_v63, %v2897_v57 }
 0x204   : > { %v2953_v6 = vmul.f32 %v5197_v25, %v2899_v8  ;;  %3064 = vst [vmem:[%s4941_s29 + $0x60] sm:$0xff] %v3032_v29  ;;  %3066 = vst [vmem:[%s4941_s29 + $0x70] sm:$0xff] %v3034_v0  ;;  %v3033_v12 = vmax.f32 %v3001_v32, 0.0  ;;  %v2900_v62 = vadd.f32 %v2750_v41, %v4901_v7  ;;  %v2902_v13 = vadd.f32 %v2863_v22, %v4904_v2  ;;  %v2752_v49 = vpop.f32.mrf.mxu0  ;;  %v2865_v37 = vpop.f32.mrf.mxu1 }
 0x205   : > { %v3035_v61 = vmax.f32 %v3003_v33, 0.0  ;;  %v3036_v14 = vmax.f32 %v3004_v53, 0.0  ;;  %v3038_v21 = vmax.f32 %v3006_v60, 0.0  ;;  %v3005_v44 = vadd.f32 %v5198_v4, %v2951_v59 }
 0x206   : > { %v3007_v35 = vadd.f32 %v5199_v36, %v2953_v6  ;;  %3065 = vst [vmem:[%s4941_s29 + $0x68] sm:$0xff] %v3033_v12  ;;  %v2954_v39 = vmul.f32 %v5194_v43, %v2900_v62  ;;  %v2956_v48 = vmul.f32 %v4775_v52, %v2902_v13  ;;  %v2901_v7 = vadd.f32 %v2752_v49, %v4906_v28  ;;  %v2756_v20 = vpop.f32.mrf.mxu0  ;;  %v2869_v5 = vpop.f32.mrf.mxu1 }
 0x207   : > { %3067 = vst [vmem:[%s4941_s29 + $0x78] sm:$0xff] %v3035_v61  ;;  %v2903_v2 = vadd.f32 %v2865_v37, %v4908_v16  ;;  %3068 = vst [vmem:[%s4941_s29 + $0x80] sm:$0xff] %v3036_v14  ;;  %v3037_v51 = vmax.f32 %v3005_v44, 0.0  ;;  %v2904_v38 = vadd.f32 %v2756_v20, %v4910_v23  ;;  %v2906_v58 = vadd.f32 %v2869_v5, %v4912_v10 }
 0x208   : > { %3070 = vst [vmem:[%s4941_s29 + $0x90] sm:$0xff] %v3038_v21  ;;  %v3039_v26 = vmax.f32 %v3007_v35, 0.0  ;;  %v3008_v24 = vadd.f32 %v4773_v40, %v2954_v39  ;;  %v3010_v11 = vadd.f32 %v5195_v9, %v2956_v48  ;;  %v2955_v28 = vmul.f32 %v5196_v63, %v2901_v7  ;;  %v2758_v16 = vpop.f32.mrf.mxu0  ;;  %v2871_v17 = vpop.f32.mrf.mxu1 }
 0x209   : > { %v2957_v1 = vmul.f32 %v5197_v25, %v2903_v2  ;;  %3069 = vst [vmem:[%s4941_s29 + $0x88] sm:$0xff] %v3037_v51  ;;  %v2958_v45 = vmul.f32 %v5194_v43, %v2904_v38  ;;  %v2960_v23 = vmul.f32 %v4775_v52, %v2906_v58  ;;  %v2905_v10 = vadd.f32 %v2758_v16, %v4920_v55 }
 0x20a   : > { %3071 = vst [vmem:[%s4941_s29 + $0x98] sm:$0xff] %v3039_v26  ;;  %v2907_v27 = vadd.f32 %v2871_v17, %v4922_v42  ;;  %v3040_v15 = vmax.f32 %v3008_v24, 0.0  ;;  %v3042_v19 = vmax.f32 %v3010_v11, 0.0  ;;  %v3009_v34 = vadd.f32 %v5198_v4, %v2955_v28  ;;  %v2762_v30 = vpop.f32.mrf.mxu0  ;;  %v2875_v3 = vpop.f32.mrf.mxu1 }
 0x20b   : > { %v3011_v46 = vadd.f32 %v5199_v36, %v2957_v1  ;;  %v3012_v56 = vadd.f32 %v4773_v40, %v2958_v45  ;;  %v3014_v50 = vadd.f32 %v5195_v9, %v2960_v23  ;;  %v2959_v57 = vmul.f32 %v5196_v63, %v2905_v10 }
 0x20c   : > { %v2961_v55 = vmul.f32 %v5197_v25, %v2907_v27  ;;  %3072 = vst [vmem:[%s4941_s29 + $0xa0] sm:$0xff] %v3040_v15  ;;  %3074 = vst [vmem:[%s4941_s29 + $0xb0] sm:$0xff] %v3042_v19  ;;  %v3041_v42 = vmax.f32 %v3009_v34, 0.0  ;;  %v2908_v29 = vadd.f32 %v2762_v30, %v4924_v31  ;;  %v2910_v0 = vadd.f32 %v2875_v3, %v4926_v47  ;;  %v2764_v32 = vpop.f32.mrf.mxu0  ;;  %v2877_v33 = vpop.f32.mrf.mxu1 }
 0x20d   : > { %v3043_v8 = vmax.f32 %v3011_v46, 0.0  ;;  %v3044_v41 = vmax.f32 %v3012_v56, 0.0  ;;  %v3046_v22 = vmax.f32 %v3014_v50, 0.0  ;;  %v3013_v53 = vadd.f32 %v5198_v4, %v2959_v57 }
 0x20e   : > { %v3015_v60 = vadd.f32 %v5199_v36, %v2961_v55  ;;  %3073 = vst [vmem:[%s4941_s29 + $0xa8] sm:$0xff] %v3041_v42  ;;  %v2962_v59 = vmul.f32 %v5194_v43, %v2908_v29  ;;  %v2964_v31 = vmul.f32 %v4775_v52, %v2910_v0  ;;  %v2909_v47 = vadd.f32 %v2764_v32, %v4932_v54 }
 0x20f   : > { %3075 = vst [vmem:[%s4941_s29 + $0xb8] sm:$0xff] %v3043_v8  ;;  %v2911_v6 = vadd.f32 %v2877_v33, %v4934_v18  ;;  %3076 = vst [vmem:[%s4941_s29 + $0xc0] sm:$0xff] %v3044_v41  ;;  %v3045_v12 = vmax.f32 %v3013_v53, 0.0 }
 0x210   : > { %3078 = vst [vmem:[%s4941_s29 + $0xd0] sm:$0xff] %v3046_v22  ;;  %v3047_v61 = vmax.f32 %v3015_v60, 0.0  ;;  %v3016_v62 = vadd.f32 %v4773_v40, %v2962_v59  ;;  %v3018_v13 = vadd.f32 %v5195_v9, %v2964_v31  ;;  %v2963_v49 = vmul.f32 %v5196_v63, %v2909_v47 }
 0x211   : > { %v2965_v43 = vmul.f32 %v5197_v25, %v2911_v6  ;;  %3077 = vst [vmem:[%s4941_s29 + $0xc8] sm:$0xff] %v3045_v12 }
 0x212   : > { %3079 = vst [vmem:[%s4941_s29 + $0xd8] sm:$0xff] %v3047_v61  ;;  %v3048_v52 = vmax.f32 %v3016_v62, 0.0  ;;  %v3050_v54 = vmax.f32 %v3018_v13, 0.0  ;;  %v3017_v18 = vadd.f32 %v5198_v4, %v2963_v49 }
 0x213   : > { %v3019_v40 = vadd.f32 %v5199_v36, %v2965_v43 }
 0x214   : > { %3080 = vst [vmem:[%s4941_s29 + $0xe0] sm:$0xff] %v3048_v52  ;;  %3082 = vst [vmem:[%s4941_s29 + $0xf0] sm:$0xff] %v3050_v54  ;;  %v3049_v9 = vmax.f32 %v3017_v18, 0.0 }
 0x215   : > { %v3051_v63 = vmax.f32 %v3019_v40, 0.0 }
 0x216   : > { %3081 = vst [vmem:[%s4941_s29 + $0xe8] sm:$0xff] %v3049_v9 }
 0x217   : > { %3083 = vst [vmem:[%s4941_s29 + $0xf8] sm:$0xff] %v3051_v63 }
 0x218   : > { %3473 = shalt.err (!%p3470_p0)
}
 0x219   : > { %s3474_s13 = scalar_lea.hbm %s5054_s8, 4096  ;;  %s3478_s22 = scalar_lea.hbm %s5108_s4, 8192 }
 0x21a   : > { %p3475_p1 = scmp.ne.s32.totalorder %s5054_s8, %s3474_s13  ;;  %p3479_p4 = scmp.lt.s32.totalorder %s5054_s8, %s5108_s4 }
 0x21b   : > { %p3480_p7 = scmp.lt.s32.totalorder %s3478_s22, %s3474_s13 }
 0x21c   : > { %p3476_p2 = pnand %p3475_p1, %p3596_p5 }
 0x21d   : > { %p3481_p8 = por %p3480_p7, %p3479_p4 }
 0x21e   : > { %p3477_p3 = pneg %p3476_p2 }
 0x220   : > { %p3482_p6 = pnand %p3481_p8, %p3477_p3 }
 0x222   : > { %3485 = shalt.err (!%p3482_p6)
}
 0x223   : > { %s3531_s28 = smov 512   ;;  %s3532_s29 = smov 32  }
 0x224   : > { %3383 = dma.vmem_to_hbm [thread:$0]  (%p3596_p5), %s5056_s5, 4096, %s5054_s8, %s5064_s19, %s3531_s28, %s3531_s28, %s3532_s29  }
 0x225 PF: > { %p3395_p9 = scmp.ge.s32.totalorder %s3524_s18, 2  ;;  %s3113_s30 = sand.u32 1, %s3512_s15  }
 0x226   : > { %p5200_p10 = scmp.ne.s32.totalorder %s5116_s26, 0  ;;  %s3114_s6 = scalar_lea.sflag [#allocation4], %s3113_s30 }
 0x228   : > { %p3390_p11 = pnand %p3395_p9, %p5200_p10 }
 0x22a   : > { %p3391_p12 = pneg %p3390_p11 }
 0x22c   : > { %3507 = dma.done.wait (%p3391_p12), %s3114_s6, 4096  }
 0x22d   : > { %3509 = vsyncadd (%p3391_p12), %s3114_s6, 4294963200  ;;  %p15_p13 = scmp.ge.s32.totalorder %s3583_s21, 4   ;;  %s5201_s15 = smov %s3516_s16 }
 0x22e   : > { %s5202_s16 = smov %s3520_s17  ;;  %s5203_s17 = smov %s3594_s24 }
 0x22f   : > { %s5204_s18 = smov %s3583_s21  ;;  %17 = sbr.rel (!%p15_p13) target bundleno = 4 (0x4), region = 86 }
 0x234   :  { %3119 = vsyncpa [#allocation3], 1 }
 0x235   :  { %3121 = vsyncpa [#allocation3 + $0x1], 1 }
 0x236   :  { %3122 = vsyncpa [#allocation4], 1 }
 0x237   :  { %3124 = vsyncpa [#allocation4 + $0x1], 1 }

</bundles_post_ra>
